<compile_context>
chip_gen: v7x
topology: tpu7x:2x2x1
jax: 0.10.0
libtpu: 0.0.40
codegen_flags: <defaults>
</compile_context>

<pallas_src>
import functools

import jax
import jax.numpy as jnp
from jax.experimental import pallas as pl
from jax.experimental.pallas import tpu as pltpu

EPS = 1e-5


def qnet_kernel(x_ref, w1_ref, v_ref, wbig_hbm, out_ref, wbuf, sem):
    """x_ref:  (B, S)   f32, unpadded input
       w1_ref: (S, H)   bf16, layer-1 weight (tiny, BlockSpec-DMA'd)
       v_ref:  (8, H)   f32, [g1,g2,g3, be1,be2,be3, bo_pad, 0]
       wbig_hbm: (3, H, H) bf16 in HBM: [W2, W3, Wo_pad] (manually streamed)
       out_ref: (B, H)  f32, lane-dense output (wrapper slices to action_size)
       wbuf:   VMEM (3, H, H) bf16 scratch; sem: DMA semaphores (3,)"""

    # Kick off all big-weight DMAs immediately; they stream behind compute and
    # are waited on individually right before use.
    for l in range(3):
        pltpu.make_async_copy(wbig_hbm.at[l], wbuf.at[l], sem.at[l]).start()

    def bn_relu(z, layer):
        # Train-mode BatchNorm1d (biased variance) folded into one scale/shift:
        #   s = gamma * rsqrt(var + eps), t = beta - mu * s, y = z * s + t
        # Two independent row reductions -> back-to-back XLU; rsqrt -> EUP slot.
        mu = jnp.mean(z, axis=0, keepdims=True)
        mu2 = jnp.mean(z * z, axis=0, keepdims=True)
        var = jnp.maximum(mu2 - mu * mu, 0.0)          # clamp: no rsqrt(neg)
        g = v_ref[layer:layer + 1, :]
        be = v_ref[layer + 3:layer + 4, :]
        s = g * jax.lax.rsqrt(var + EPS)
        t = be - mu * s
        return jnp.maximum(z * s + t, 0.0)

    # Layer 1: bf16 operands on the MXU, f32 accumulation; the fc1 bias is
    # omitted (cancelled exactly by the train-mode BN mean subtraction).
    z = jnp.dot(x_ref[...].astype(jnp.bfloat16), w1_ref[...],
                preferred_element_type=jnp.float32)
    h = bn_relu(z, 0)

    # Layers 2 and 3: wait on each streamed weight just before its dot.
    for l in range(2):
        pltpu.make_async_copy(wbig_hbm.at[l], wbuf.at[l], sem.at[l]).wait()
        z = jnp.dot(h.astype(jnp.bfloat16), wbuf[l],
                    preferred_element_type=jnp.float32)
        h = bn_relu(z, l + 1)

    # Output layer: lane-dense (B, H) store; real output bias (padded) lives in
    # v_ref row 6, the padded Wo columns beyond action_size are zero.
    pltpu.make_async_copy(wbig_hbm.at[2], wbuf.at[2], sem.at[2]).wait()
    out_ref[...] = (jnp.dot(h.astype(jnp.bfloat16), wbuf[2],
                            preferred_element_type=jnp.float32)
                    + v_ref[6:7, :])


def init_params(key, state_size, action_size, H):
    """PyTorch-style init (Linear: U[-1/sqrt(fan_in), +], BN: gamma=1, beta=0).

    Weights are bf16-quantized once so kernel and reference share identical
    values.  Returns (raw params for the pure-JAX reference, kernel operands).
    """
    def linear(k, fan_in, fan_out):
        kw, kb = jax.random.split(k)
        bound = 1.0 / jnp.sqrt(float(fan_in))
        w = jax.random.uniform(kw, (fan_in, fan_out), jnp.float32, -bound, bound)
        b = jax.random.uniform(kb, (1, fan_out), jnp.float32, -bound, bound)
        w = w.astype(jnp.bfloat16).astype(jnp.float32)   # shared bf16 rounding
        return w, b

    k1, k2, k3, k4 = jax.random.split(key, 4)
    w1, b1 = linear(k1, state_size, H)
    w2, b2 = linear(k2, H, H)
    w3, b3 = linear(k3, H, H)
    wo, bo = linear(k4, H, action_size)

    g1 = g2 = g3 = jnp.ones((1, H), jnp.float32)
    be1 = be2 = be3 = jnp.zeros((1, H), jnp.float32)

    raw = (w1, b1, g1, be1, w2, b2, g2, be2, w3, b3, g3, be3, wo, bo)

    # --- kernel operands ---
    w1_k = w1.astype(jnp.bfloat16)                                   # (S, H)
    wo_pad = jnp.zeros((H, H), jnp.float32).at[:, :action_size].set(wo)
    w_big = jnp.stack([w2, w3, wo_pad], axis=0).astype(jnp.bfloat16)  # (3,H,H)

    bo_pad = jnp.zeros((1, H), jnp.float32).at[:, :action_size].set(bo)
    vec = jnp.concatenate(
        [g1, g2, g3, be1, be2, be3, bo_pad, jnp.zeros((1, H), jnp.float32)],
        axis=0)                                                       # (8, H)

    return raw, (w1_k, w_big, vec)


def qnetwork_forward(x, w1, w_big, vec, action_size):
    B = x.shape[0]
    H = w_big.shape[-1]

    # Live footprint: input/output/activation f32 slabs + bf16 weights + margin.
    weight_bytes = w1.size * 2 + w_big.size * 2 + vec.size * 4
    act_bytes = (x.size + 3 * B * H) * 4
    vmem_limit = int(2 * (weight_bytes + act_bytes)) + (2 << 20)

    out = pl.pallas_call(
        qnet_kernel,
        out_shape=jax.ShapeDtypeStruct((B, H), jnp.float32),
        in_specs=[pl.BlockSpec(memory_space=pltpu.VMEM),   # x (unpadded)
                  pl.BlockSpec(memory_space=pltpu.VMEM),   # W1 (tiny)
                  pl.BlockSpec(memory_space=pltpu.VMEM),   # gammas/betas/bias
                  pl.BlockSpec(memory_space=pl.ANY)],      # big weights (HBM)
        out_specs=pl.BlockSpec(memory_space=pltpu.VMEM),
        scratch_shapes=[pltpu.VMEM((3, H, H), jnp.bfloat16),
                        pltpu.SemaphoreType.DMA((3,))],
        compiler_params=pltpu.CompilerParams(vmem_limit_bytes=vmem_limit),
    )(x, w1, vec, w_big)
    return out[:, :action_size]


def qnetwork_ref(x, raw_params):
    """Pure-JAX reference matching PyTorch semantics exactly (Linear with bias,
    train-mode BatchNorm1d with biased variance, ReLU, final Linear).  The dots
    use the same bf16 operands / f32 accumulation as the kernel."""
    (w1, b1, g1, be1, w2, b2, g2, be2, w3, b3, g3, be3, wo, bo) = raw_params

    def lin(h, w, b):
        return jnp.dot(h.astype(jnp.bfloat16), w.astype(jnp.bfloat16),
                       preferred_element_type=jnp.float32) + b

    def blk(h, w, b, g, be):
        z = lin(h, w, b)
        mu = z.mean(0, keepdims=True)
        var = ((z - mu) ** 2).mean(0, keepdims=True)     # biased variance
        return jnp.maximum((z - mu) / jnp.sqrt(var + EPS) * g + be, 0.0)

    h = blk(x, w1, b1, g1, be1)
    h = blk(h, w2, b2, g2, be2)
    h = blk(h, w3, b3, g3, be3)
    return lin(h, wo, bo)


if __name__ == "__main__":
    # Module defaults: fc*_units=256.  Batch raised to 128 so the matmuls fill
    # MXU rows (still a tiny problem: 128x16 input).
    B, state_size, action_size, H = 128, 16, 4, 256

    key = jax.random.PRNGKey(0)
    kx, kp = jax.random.split(key)
    x = jax.random.normal(kx, (B, state_size), dtype=jnp.float32)
    raw_params, (w1, w_big, vec) = init_params(kp, state_size, action_size, H)

    fwd = jax.jit(functools.partial(qnetwork_forward, action_size=action_size))
    out = fwd(x, w1, w_big, vec)
    out = jax.block_until_ready(out)

    ref = qnetwork_ref(x, raw_params)
    assert out.shape == (B, action_size)
    assert jnp.allclose(out, ref, atol=2e-3, rtol=2e-3), "mismatch vs JAX reference"

    print("KERNEL_OK")
</pallas_src>

<mosaic_0001>
module attributes {stable_mosaic.version = 11 : i64} {
  func.func @qnet_kernel(%arg0: memref<128x16xf32, #tpu.memory_space<vmem>>, %arg1: memref<16x256xbf16, #tpu.memory_space<vmem>>, %arg2: memref<8x256xf32, #tpu.memory_space<vmem>>, %arg3: memref<3x256x256xbf16, #tpu.memory_space<any>>, %arg4: memref<128x256xf32, #tpu.memory_space<vmem>>, %arg5: memref<3x256x256xbf16, #tpu.memory_space<vmem>>, %arg6: memref<3x!tpu.dma_semaphore, #tpu.memory_space<semaphore_mem>>) attributes {dimension_semantics = [], scalar_prefetch = 0 : i64, scratch_operands = 2 : i64, tpu.core_type = #tpu.core_type<tc>} {
    %c0_i32 = arith.constant 0 : i32
    %c0_i32_0 = arith.constant 0 : i32
    %c0_i32_1 = arith.constant 0 : i32
    %c0_i32_2 = arith.constant 0 : i32
    %c0_i32_3 = arith.constant 0 : i32
    %0 = tpu.memref_slice %arg3[%c0_i32, %c0_i32_2, %c0_i32_3] : memref<3x256x256xbf16, #tpu.memory_space<any>> -> memref<1x256x256xbf16, #tpu.memory_space<any>>
    %1 = tpu.memref_squeeze %0 : memref<1x256x256xbf16, #tpu.memory_space<any>> -> memref<256x256xbf16, #tpu.memory_space<any>>
    %c0_i32_4 = arith.constant 0 : i32
    %c0_i32_5 = arith.constant 0 : i32
    %2 = tpu.memref_slice %arg5[%c0_i32_0, %c0_i32_4, %c0_i32_5] : memref<3x256x256xbf16, #tpu.memory_space<vmem>> -> memref<1x256x256xbf16, #tpu.memory_space<vmem>>
    %3 = tpu.memref_squeeze %2 : memref<1x256x256xbf16, #tpu.memory_space<vmem>> -> memref<256x256xbf16, #tpu.memory_space<vmem>>
    %4 = tpu.memref_slice %arg6[%c0_i32_1] : memref<3x!tpu.dma_semaphore, #tpu.memory_space<semaphore_mem>> -> memref<1x!tpu.dma_semaphore, #tpu.memory_space<semaphore_mem>>
    %5 = tpu.memref_squeeze %4 : memref<1x!tpu.dma_semaphore, #tpu.memory_space<semaphore_mem>> -> memref<!tpu.dma_semaphore, #tpu.memory_space<semaphore_mem>>
    tpu.enqueue_dma source(%1 : memref<256x256xbf16, #tpu.memory_space<any>>) target(%3 : memref<256x256xbf16, #tpu.memory_space<vmem>>) target_semaphore(%5 : memref<!tpu.dma_semaphore, #tpu.memory_space<semaphore_mem>>)
    %c1_i32 = arith.constant 1 : i32
    %c1_i32_6 = arith.constant 1 : i32
    %c1_i32_7 = arith.constant 1 : i32
    %c0_i32_8 = arith.constant 0 : i32
    %c0_i32_9 = arith.constant 0 : i32
    %6 = tpu.memref_slice %arg3[%c1_i32, %c0_i32_8, %c0_i32_9] : memref<3x256x256xbf16, #tpu.memory_space<any>> -> memref<1x256x256xbf16, #tpu.memory_space<any>>
    %7 = tpu.memref_squeeze %6 : memref<1x256x256xbf16, #tpu.memory_space<any>> -> memref<256x256xbf16, #tpu.memory_space<any>>
    %c0_i32_10 = arith.constant 0 : i32
    %c0_i32_11 = arith.constant 0 : i32
    %8 = tpu.memref_slice %arg5[%c1_i32_6, %c0_i32_10, %c0_i32_11] : memref<3x256x256xbf16, #tpu.memory_space<vmem>> -> memref<1x256x256xbf16, #tpu.memory_space<vmem>>
    %9 = tpu.memref_squeeze %8 : memref<1x256x256xbf16, #tpu.memory_space<vmem>> -> memref<256x256xbf16, #tpu.memory_space<vmem>>
    %10 = tpu.memref_slice %arg6[%c1_i32_7] : memref<3x!tpu.dma_semaphore, #tpu.memory_space<semaphore_mem>> -> memref<1x!tpu.dma_semaphore, #tpu.memory_space<semaphore_mem>>
    %11 = tpu.memref_squeeze %10 : memref<1x!tpu.dma_semaphore, #tpu.memory_space<semaphore_mem>> -> memref<!tpu.dma_semaphore, #tpu.memory_space<semaphore_mem>>
    tpu.enqueue_dma source(%7 : memref<256x256xbf16, #tpu.memory_space<any>>) target(%9 : memref<256x256xbf16, #tpu.memory_space<vmem>>) target_semaphore(%11 : memref<!tpu.dma_semaphore, #tpu.memory_space<semaphore_mem>>)
    %c2_i32 = arith.constant 2 : i32
    %c2_i32_12 = arith.constant 2 : i32
    %c2_i32_13 = arith.constant 2 : i32
    %c0_i32_14 = arith.constant 0 : i32
    %c0_i32_15 = arith.constant 0 : i32
    %12 = tpu.memref_slice %arg3[%c2_i32, %c0_i32_14, %c0_i32_15] : memref<3x256x256xbf16, #tpu.memory_space<any>> -> memref<1x256x256xbf16, #tpu.memory_space<any>>
    %13 = tpu.memref_squeeze %12 : memref<1x256x256xbf16, #tpu.memory_space<any>> -> memref<256x256xbf16, #tpu.memory_space<any>>
    %c0_i32_16 = arith.constant 0 : i32
    %c0_i32_17 = arith.constant 0 : i32
    %14 = tpu.memref_slice %arg5[%c2_i32_12, %c0_i32_16, %c0_i32_17] : memref<3x256x256xbf16, #tpu.memory_space<vmem>> -> memref<1x256x256xbf16, #tpu.memory_space<vmem>>
    %15 = tpu.memref_squeeze %14 : memref<1x256x256xbf16, #tpu.memory_space<vmem>> -> memref<256x256xbf16, #tpu.memory_space<vmem>>
    %16 = tpu.memref_slice %arg6[%c2_i32_13] : memref<3x!tpu.dma_semaphore, #tpu.memory_space<semaphore_mem>> -> memref<1x!tpu.dma_semaphore, #tpu.memory_space<semaphore_mem>>
    %17 = tpu.memref_squeeze %16 : memref<1x!tpu.dma_semaphore, #tpu.memory_space<semaphore_mem>> -> memref<!tpu.dma_semaphore, #tpu.memory_space<semaphore_mem>>
    tpu.enqueue_dma source(%13 : memref<256x256xbf16, #tpu.memory_space<any>>) target(%15 : memref<256x256xbf16, #tpu.memory_space<vmem>>) target_semaphore(%17 : memref<!tpu.dma_semaphore, #tpu.memory_space<semaphore_mem>>)
    %c0 = arith.constant 0 : index
    %c0_18 = arith.constant 0 : index
    %18 = vector.load %arg0[%c0, %c0_18] : memref<128x16xf32, #tpu.memory_space<vmem>>, vector<128x16xf32>
    %19 = arith.truncf %18 : vector<128x16xf32> to vector<128x16xbf16>
    %c0_19 = arith.constant 0 : index
    %c0_20 = arith.constant 0 : index
    %20 = vector.load %arg1[%c0_19, %c0_20] : memref<16x256xbf16, #tpu.memory_space<vmem>>, vector<16x256xbf16>
    %cst = arith.constant dense<0.000000e+00> : vector<128x256xf32>
    %21 = tpu.matmul %19, %20, %cst {dimension_numbers = #tpu.dot_dimension_numbers<[1], [0], [0], [1], [0, 0, 1, 1], [], []>} : vector<128x16xbf16>, vector<16x256xbf16>, vector<128x256xf32> -> vector<128x256xf32>
    %cst_21 = arith.constant dense<0.000000e+00> : vector<256xf32>
    %22 = vector.multi_reduction <add>, %21, %cst_21 [0] : vector<128x256xf32> to vector<256xf32>
    %23 = vector.shape_cast %22 : vector<256xf32> to vector<1x256xf32>
    %cst_22 = arith.constant 1.280000e+02 : f32
    %24 = vector.broadcast %cst_22 : f32 to vector<1x256xf32>
    %25 = arith.divf %23, %24 : vector<1x256xf32>
    %26 = arith.mulf %21, %21 : vector<128x256xf32>
    %cst_23 = arith.constant dense<0.000000e+00> : vector<256xf32>
    %27 = vector.multi_reduction <add>, %26, %cst_23 [0] : vector<128x256xf32> to vector<256xf32>
    %28 = vector.shape_cast %27 : vector<256xf32> to vector<1x256xf32>
    %cst_24 = arith.constant 1.280000e+02 : f32
    %29 = vector.broadcast %cst_24 : f32 to vector<1x256xf32>
    %30 = arith.divf %28, %29 : vector<1x256xf32>
    %31 = arith.mulf %25, %25 : vector<1x256xf32>
    %32 = arith.subf %30, %31 : vector<1x256xf32>
    %cst_25 = arith.constant 0.000000e+00 : f32
    %33 = vector.broadcast %cst_25 : f32 to vector<1x256xf32>
    %34 = arith.maximumf %32, %33 : vector<1x256xf32>
    %c0_26 = arith.constant 0 : index
    %c0_27 = arith.constant 0 : index
    %35 = vector.load %arg2[%c0_26, %c0_27] : memref<8x256xf32, #tpu.memory_space<vmem>>, vector<1x256xf32>
    %c3 = arith.constant 3 : index
    %c0_28 = arith.constant 0 : index
    %36 = vector.load %arg2[%c3, %c0_28] : memref<8x256xf32, #tpu.memory_space<vmem>>, vector<1x256xf32>
    %cst_29 = arith.constant 9.99999974E-6 : f32
    %37 = vector.broadcast %cst_29 : f32 to vector<1x256xf32>
    %38 = arith.addf %34, %37 : vector<1x256xf32>
    %39 = math.rsqrt %38 : vector<1x256xf32>
    %40 = arith.mulf %35, %39 : vector<1x256xf32>
    %41 = arith.mulf %25, %40 : vector<1x256xf32>
    %42 = arith.subf %36, %41 : vector<1x256xf32>
    %43 = vector.broadcast %40 : vector<1x256xf32> to vector<128x256xf32>
    %44 = arith.mulf %21, %43 : vector<128x256xf32>
    %45 = vector.broadcast %42 : vector<1x256xf32> to vector<128x256xf32>
    %46 = arith.addf %44, %45 : vector<128x256xf32>
    %cst_30 = arith.constant 0.000000e+00 : f32
    %47 = vector.broadcast %cst_30 : f32 to vector<128x256xf32>
    %48 = arith.maximumf %46, %47 : vector<128x256xf32>
    %c0_i32_31 = arith.constant 0 : i32
    %c0_i32_32 = arith.constant 0 : i32
    %c0_i32_33 = arith.constant 0 : i32
    %c0_i32_34 = arith.constant 0 : i32
    %c0_i32_35 = arith.constant 0 : i32
    %49 = tpu.memref_slice %arg3[%c0_i32_31, %c0_i32_34, %c0_i32_35] : memref<3x256x256xbf16, #tpu.memory_space<any>> -> memref<1x256x256xbf16, #tpu.memory_space<any>>
    %50 = tpu.memref_squeeze %49 : memref<1x256x256xbf16, #tpu.memory_space<any>> -> memref<256x256xbf16, #tpu.memory_space<any>>
    %c0_i32_36 = arith.constant 0 : i32
    %c0_i32_37 = arith.constant 0 : i32
    %51 = tpu.memref_slice %arg5[%c0_i32_32, %c0_i32_36, %c0_i32_37] : memref<3x256x256xbf16, #tpu.memory_space<vmem>> -> memref<1x256x256xbf16, #tpu.memory_space<vmem>>
    %52 = tpu.memref_squeeze %51 : memref<1x256x256xbf16, #tpu.memory_space<vmem>> -> memref<256x256xbf16, #tpu.memory_space<vmem>>
    %53 = tpu.memref_slice %arg6[%c0_i32_33] : memref<3x!tpu.dma_semaphore, #tpu.memory_space<semaphore_mem>> -> memref<1x!tpu.dma_semaphore, #tpu.memory_space<semaphore_mem>>
    %54 = tpu.memref_squeeze %53 : memref<1x!tpu.dma_semaphore, #tpu.memory_space<semaphore_mem>> -> memref<!tpu.dma_semaphore, #tpu.memory_space<semaphore_mem>>
    tpu.wait_dma2 semaphore(%54 : memref<!tpu.dma_semaphore, #tpu.memory_space<semaphore_mem>>) src(%50 : memref<256x256xbf16, #tpu.memory_space<any>>) dst(%52 : memref<256x256xbf16, #tpu.memory_space<vmem>>)
    %55 = arith.truncf %48 : vector<128x256xf32> to vector<128x256xbf16>
    %c0_38 = arith.constant 0 : index
    %c0_39 = arith.constant 0 : index
    %c0_40 = arith.constant 0 : index
    %56 = vector.load %arg5[%c0_38, %c0_39, %c0_40] : memref<3x256x256xbf16, #tpu.memory_space<vmem>>, vector<1x256x256xbf16>
    %57 = vector.shape_cast %56 : vector<1x256x256xbf16> to vector<256x256xbf16>
    %cst_41 = arith.constant dense<0.000000e+00> : vector<128x256xf32>
    %58 = tpu.matmul %55, %57, %cst_41 {dimension_numbers = #tpu.dot_dimension_numbers<[1], [0], [0], [1], [0, 0, 1, 1], [], []>} : vector<128x256xbf16>, vector<256x256xbf16>, vector<128x256xf32> -> vector<128x256xf32>
    %cst_42 = arith.constant dense<0.000000e+00> : vector<256xf32>
    %59 = vector.multi_reduction <add>, %58, %cst_42 [0] : vector<128x256xf32> to vector<256xf32>
    %60 = vector.shape_cast %59 : vector<256xf32> to vector<1x256xf32>
    %cst_43 = arith.constant 1.280000e+02 : f32
    %61 = vector.broadcast %cst_43 : f32 to vector<1x256xf32>
    %62 = arith.divf %60, %61 : vector<1x256xf32>
    %63 = arith.mulf %58, %58 : vector<128x256xf32>
    %cst_44 = arith.constant dense<0.000000e+00> : vector<256xf32>
    %64 = vector.multi_reduction <add>, %63, %cst_44 [0] : vector<128x256xf32> to vector<256xf32>
    %65 = vector.shape_cast %64 : vector<256xf32> to vector<1x256xf32>
    %cst_45 = arith.constant 1.280000e+02 : f32
    %66 = vector.broadcast %cst_45 : f32 to vector<1x256xf32>
    %67 = arith.divf %65, %66 : vector<1x256xf32>
    %68 = arith.mulf %62, %62 : vector<1x256xf32>
    %69 = arith.subf %67, %68 : vector<1x256xf32>
    %cst_46 = arith.constant 0.000000e+00 : f32
    %70 = vector.broadcast %cst_46 : f32 to vector<1x256xf32>
    %71 = arith.maximumf %69, %70 : vector<1x256xf32>
    %c1 = arith.constant 1 : index
    %c0_47 = arith.constant 0 : index
    %72 = vector.load %arg2[%c1, %c0_47] : memref<8x256xf32, #tpu.memory_space<vmem>>, vector<1x256xf32>
    %c4 = arith.constant 4 : index
    %c0_48 = arith.constant 0 : index
    %73 = vector.load %arg2[%c4, %c0_48] : memref<8x256xf32, #tpu.memory_space<vmem>>, vector<1x256xf32>
    %cst_49 = arith.constant 9.99999974E-6 : f32
    %74 = vector.broadcast %cst_49 : f32 to vector<1x256xf32>
    %75 = arith.addf %71, %74 : vector<1x256xf32>
    %76 = math.rsqrt %75 : vector<1x256xf32>
    %77 = arith.mulf %72, %76 : vector<1x256xf32>
    %78 = arith.mulf %62, %77 : vector<1x256xf32>
    %79 = arith.subf %73, %78 : vector<1x256xf32>
    %80 = vector.broadcast %77 : vector<1x256xf32> to vector<128x256xf32>
    %81 = arith.mulf %58, %80 : vector<128x256xf32>
    %82 = vector.broadcast %79 : vector<1x256xf32> to vector<128x256xf32>
    %83 = arith.addf %81, %82 : vector<128x256xf32>
    %cst_50 = arith.constant 0.000000e+00 : f32
    %84 = vector.broadcast %cst_50 : f32 to vector<128x256xf32>
    %85 = arith.maximumf %83, %84 : vector<128x256xf32>
    %c1_i32_51 = arith.constant 1 : i32
    %c1_i32_52 = arith.constant 1 : i32
    %c1_i32_53 = arith.constant 1 : i32
    %c0_i32_54 = arith.constant 0 : i32
    %c0_i32_55 = arith.constant 0 : i32
    %86 = tpu.memref_slice %arg3[%c1_i32_51, %c0_i32_54, %c0_i32_55] : memref<3x256x256xbf16, #tpu.memory_space<any>> -> memref<1x256x256xbf16, #tpu.memory_space<any>>
    %87 = tpu.memref_squeeze %86 : memref<1x256x256xbf16, #tpu.memory_space<any>> -> memref<256x256xbf16, #tpu.memory_space<any>>
    %c0_i32_56 = arith.constant 0 : i32
    %c0_i32_57 = arith.constant 0 : i32
    %88 = tpu.memref_slice %arg5[%c1_i32_52, %c0_i32_56, %c0_i32_57] : memref<3x256x256xbf16, #tpu.memory_space<vmem>> -> memref<1x256x256xbf16, #tpu.memory_space<vmem>>
    %89 = tpu.memref_squeeze %88 : memref<1x256x256xbf16, #tpu.memory_space<vmem>> -> memref<256x256xbf16, #tpu.memory_space<vmem>>
    %90 = tpu.memref_slice %arg6[%c1_i32_53] : memref<3x!tpu.dma_semaphore, #tpu.memory_space<semaphore_mem>> -> memref<1x!tpu.dma_semaphore, #tpu.memory_space<semaphore_mem>>
    %91 = tpu.memref_squeeze %90 : memref<1x!tpu.dma_semaphore, #tpu.memory_space<semaphore_mem>> -> memref<!tpu.dma_semaphore, #tpu.memory_space<semaphore_mem>>
    tpu.wait_dma2 semaphore(%91 : memref<!tpu.dma_semaphore, #tpu.memory_space<semaphore_mem>>) src(%87 : memref<256x256xbf16, #tpu.memory_space<any>>) dst(%89 : memref<256x256xbf16, #tpu.memory_space<vmem>>)
    %92 = arith.truncf %85 : vector<128x256xf32> to vector<128x256xbf16>
    %c1_58 = arith.constant 1 : index
    %c0_59 = arith.constant 0 : index
    %c0_60 = arith.constant 0 : index
    %93 = vector.load %arg5[%c1_58, %c0_59, %c0_60] : memref<3x256x256xbf16, #tpu.memory_space<vmem>>, vector<1x256x256xbf16>
    %94 = vector.shape_cast %93 : vector<1x256x256xbf16> to vector<256x256xbf16>
    %cst_61 = arith.constant dense<0.000000e+00> : vector<128x256xf32>
    %95 = tpu.matmul %92, %94, %cst_61 {dimension_numbers = #tpu.dot_dimension_numbers<[1], [0], [0], [1], [0, 0, 1, 1], [], []>} : vector<128x256xbf16>, vector<256x256xbf16>, vector<128x256xf32> -> vector<128x256xf32>
    %cst_62 = arith.constant dense<0.000000e+00> : vector<256xf32>
    %96 = vector.multi_reduction <add>, %95, %cst_62 [0] : vector<128x256xf32> to vector<256xf32>
    %97 = vector.shape_cast %96 : vector<256xf32> to vector<1x256xf32>
    %cst_63 = arith.constant 1.280000e+02 : f32
    %98 = vector.broadcast %cst_63 : f32 to vector<1x256xf32>
    %99 = arith.divf %97, %98 : vector<1x256xf32>
    %100 = arith.mulf %95, %95 : vector<128x256xf32>
    %cst_64 = arith.constant dense<0.000000e+00> : vector<256xf32>
    %101 = vector.multi_reduction <add>, %100, %cst_64 [0] : vector<128x256xf32> to vector<256xf32>
    %102 = vector.shape_cast %101 : vector<256xf32> to vector<1x256xf32>
    %cst_65 = arith.constant 1.280000e+02 : f32
    %103 = vector.broadcast %cst_65 : f32 to vector<1x256xf32>
    %104 = arith.divf %102, %103 : vector<1x256xf32>
    %105 = arith.mulf %99, %99 : vector<1x256xf32>
    %106 = arith.subf %104, %105 : vector<1x256xf32>
    %cst_66 = arith.constant 0.000000e+00 : f32
    %107 = vector.broadcast %cst_66 : f32 to vector<1x256xf32>
    %108 = arith.maximumf %106, %107 : vector<1x256xf32>
    %c2 = arith.constant 2 : index
    %c0_67 = arith.constant 0 : index
    %109 = vector.load %arg2[%c2, %c0_67] : memref<8x256xf32, #tpu.memory_space<vmem>>, vector<1x256xf32>
    %c5 = arith.constant 5 : index
    %c0_68 = arith.constant 0 : index
    %110 = vector.load %arg2[%c5, %c0_68] : memref<8x256xf32, #tpu.memory_space<vmem>>, vector<1x256xf32>
    %cst_69 = arith.constant 9.99999974E-6 : f32
    %111 = vector.broadcast %cst_69 : f32 to vector<1x256xf32>
    %112 = arith.addf %108, %111 : vector<1x256xf32>
    %113 = math.rsqrt %112 : vector<1x256xf32>
    %114 = arith.mulf %109, %113 : vector<1x256xf32>
    %115 = arith.mulf %99, %114 : vector<1x256xf32>
    %116 = arith.subf %110, %115 : vector<1x256xf32>
    %117 = vector.broadcast %114 : vector<1x256xf32> to vector<128x256xf32>
    %118 = arith.mulf %95, %117 : vector<128x256xf32>
    %119 = vector.broadcast %116 : vector<1x256xf32> to vector<128x256xf32>
    %120 = arith.addf %118, %119 : vector<128x256xf32>
    %cst_70 = arith.constant 0.000000e+00 : f32
    %121 = vector.broadcast %cst_70 : f32 to vector<128x256xf32>
    %122 = arith.maximumf %120, %121 : vector<128x256xf32>
    %c2_i32_71 = arith.constant 2 : i32
    %c2_i32_72 = arith.constant 2 : i32
    %c2_i32_73 = arith.constant 2 : i32
    %c0_i32_74 = arith.constant 0 : i32
    %c0_i32_75 = arith.constant 0 : i32
    %123 = tpu.memref_slice %arg3[%c2_i32_71, %c0_i32_74, %c0_i32_75] : memref<3x256x256xbf16, #tpu.memory_space<any>> -> memref<1x256x256xbf16, #tpu.memory_space<any>>
    %124 = tpu.memref_squeeze %123 : memref<1x256x256xbf16, #tpu.memory_space<any>> -> memref<256x256xbf16, #tpu.memory_space<any>>
    %c0_i32_76 = arith.constant 0 : i32
    %c0_i32_77 = arith.constant 0 : i32
    %125 = tpu.memref_slice %arg5[%c2_i32_72, %c0_i32_76, %c0_i32_77] : memref<3x256x256xbf16, #tpu.memory_space<vmem>> -> memref<1x256x256xbf16, #tpu.memory_space<vmem>>
    %126 = tpu.memref_squeeze %125 : memref<1x256x256xbf16, #tpu.memory_space<vmem>> -> memref<256x256xbf16, #tpu.memory_space<vmem>>
    %127 = tpu.memref_slice %arg6[%c2_i32_73] : memref<3x!tpu.dma_semaphore, #tpu.memory_space<semaphore_mem>> -> memref<1x!tpu.dma_semaphore, #tpu.memory_space<semaphore_mem>>
    %128 = tpu.memref_squeeze %127 : memref<1x!tpu.dma_semaphore, #tpu.memory_space<semaphore_mem>> -> memref<!tpu.dma_semaphore, #tpu.memory_space<semaphore_mem>>
    tpu.wait_dma2 semaphore(%128 : memref<!tpu.dma_semaphore, #tpu.memory_space<semaphore_mem>>) src(%124 : memref<256x256xbf16, #tpu.memory_space<any>>) dst(%126 : memref<256x256xbf16, #tpu.memory_space<vmem>>)
    %129 = arith.truncf %122 : vector<128x256xf32> to vector<128x256xbf16>
    %c2_78 = arith.constant 2 : index
    %c0_79 = arith.constant 0 : index
    %c0_80 = arith.constant 0 : index
    %130 = vector.load %arg5[%c2_78, %c0_79, %c0_80] : memref<3x256x256xbf16, #tpu.memory_space<vmem>>, vector<1x256x256xbf16>
    %131 = vector.shape_cast %130 : vector<1x256x256xbf16> to vector<256x256xbf16>
    %cst_81 = arith.constant dense<0.000000e+00> : vector<128x256xf32>
    %132 = tpu.matmul %129, %131, %cst_81 {dimension_numbers = #tpu.dot_dimension_numbers<[1], [0], [0], [1], [0, 0, 1, 1], [], []>} : vector<128x256xbf16>, vector<256x256xbf16>, vector<128x256xf32> -> vector<128x256xf32>
    %c6 = arith.constant 6 : index
    %c0_82 = arith.constant 0 : index
    %133 = vector.load %arg2[%c6, %c0_82] : memref<8x256xf32, #tpu.memory_space<vmem>>, vector<1x256xf32>
    %134 = vector.broadcast %133 : vector<1x256xf32> to vector<128x256xf32>
    %135 = arith.addf %132, %134 : vector<128x256xf32>
    %c0_83 = arith.constant 0 : index
    %c0_84 = arith.constant 0 : index
    %136 = vector.load %arg4[%c0_83, %c0_84] : memref<128x256xf32, #tpu.memory_space<vmem>>, vector<128x256xf32>
    tpu.vector_store %arg4[%c0_83, %c0_84], %135 {strides = array<i32>} : memref<128x256xf32, #tpu.memory_space<vmem>>, vector<128x256xf32>,
    return
  }
}

</mosaic_0001>

<bundles_post_ra>
// kernel: qnetwork_forward.1
= control target key start
LH: loop header
LB: loop body
LE: loop exit
PB: predicated region body
PF: predicated region fallthrough
CT: control target
= control target key end

     0   :  { %s20_s15 = sld [smem:[#allocation0]]   ;;  %s1829_s16 = smov [#allocation2]   ;;  %v1830_v0 = vmov 0   ;;  %vm161_vm0 = vcmask 130048   ;;  %s3200_s0 = inlined_call_operand.vmem [shape: f32[128,16], index: 0, kind: input, shape index: {}]   ;;  %s3201_s1 = inlined_call_operand.vmem [shape: bf16[16,256], index: 1, kind: input, shape index: {}]   ;;  %s3202_s2 = inlined_call_operand.vmem [shape: f32[8,256], index: 2, kind: input, shape index: {}]   ;;  %s3203_s3 = inlined_call_operand.hbm [shape: bf16[3,256,256], index: 3, kind: input, shape index: {}]   ;;  %s3204_s4 = inlined_call_operand.vmem [shape: f32[128,256], index: 4, kind: output, shape index: {}]  }
   0x1   :  { %s28_s17 = sshll.u32 %s1829_s16, 4  ;;  %218 = vmatprep.mubr.bf16.mxu0 %v1830_v0  ;;  %s1831_s18 = smov 256   ;;  %s29_s17 = int_to_ptr.vmem [resolvable:$true] %s28_s17 }
   0x2   :  { %32 = sst [smem:[#allocation5]] %s1831_s18  ;;  %s1832_s19 = smov 2  }
   0x3   :  { %34 = sst [smem:[#allocation5 + $0x1]] %s1831_s18  ;;  %s1833_s20 = smov 64  }
   0x4   :  { %36 = sst [smem:[#allocation5 + $0x2]] %s1832_s19  ;;  %s1834_s22 = smov 128  }
   0x5   :  { %38 = sst [smem:[#allocation5 + $0x3]] %s1833_s20  ;;  %s1835_s24 = smov 4  }
   0x6   :  { %s1735_s21 = sshll.u32 %s20_s15, 26  ;;  %40 = sst [smem:[#allocation5 + $0x4]] %s1834_s22 }
   0x7   :  { %s1876_s23 = sadd.s32 134217728, %s1735_s21  ;;  %42 = sst [smem:[#allocation5 + $0x5]] %s1832_s19 }
   0x8   :  { %44 = sst [smem:[#allocation5 + $0x6]] %s1834_s22  ;;  %s1836_s25 = smov [#allocation3]  }
   0x9   :  { %46 = sst [smem:[#allocation5 + $0x7]] %s1833_s20  ;;  %s1837_s26 = smov [#allocation4]  }
   0xa   :  { %48 = sst [smem:[#allocation5 + $0x8]] %s1835_s24  ;;  %s1838_s29 = smov [#allocation2 + $0x100]  }
   0xb   :  { %50 = dma.general %s3203_s3, 4096, %s29_s17, %s1836_s25, %s1837_s26, [#allocation5], %s1876_s23, 0  }
   0xc   :  { %69 = sst [smem:[#allocation7]] %s1831_s18  ;;  %s65_s30 = sshll.u32 %s1838_s29, 4  ;;  %s66_s30 = int_to_ptr.vmem [resolvable:$true] %s65_s30 }
   0xd   :  { %71 = sst [smem:[#allocation7 + $0x1]] %s1831_s18  ;;  %s51_s7 = scalar_lea.hbm %s3203_s3, 4096 }
   0xe   :  { %73 = sst [smem:[#allocation7 + $0x2]] %s1832_s19  ;;  %s1839_s8 = smov [#allocation3 + $0x1]  }
   0xf   :  { %75 = sst [smem:[#allocation7 + $0x3]] %s1833_s20  ;;  %s1840_s9 = smov [#allocation6]  }
  0x10   :  { %77 = sst [smem:[#allocation7 + $0x4]] %s1834_s22  ;;  %s1841_s10 = smov [#allocation2 + $0x200]  }
  0x11   :  { %79 = sst [smem:[#allocation7 + $0x5]] %s1832_s19  ;;  %s102_s11 = sshll.u32 %s1841_s10, 4  ;;  %s103_s11 = int_to_ptr.vmem [resolvable:$true] %s102_s11 }
  0x12   :  { %81 = sst [smem:[#allocation7 + $0x6]] %s1834_s22  ;;  %s88_s14 = scalar_lea.hbm %s3203_s3, 8192 }
  0x13   :  { %83 = sst [smem:[#allocation7 + $0x7]] %s1833_s20  ;;  %s1842_s15 = smov [#allocation3 + $0x2]  }
  0x14   :  { %85 = sst [smem:[#allocation7 + $0x8]] %s1835_s24  ;;  %s1843_s16 = smov [#allocation8]  }
  0x15   :  { %87 = dma.general %s51_s7, 4096, %s66_s30, %s1839_s8, %s1840_s9, [#allocation7], %s1876_s23, 0  }
  0x16   :  { %106 = sst [smem:[#allocation9]] %s1831_s18 }
  0x17   :  { %108 = sst [smem:[#allocation9 + $0x1]] %s1831_s18 }
  0x18   :  { %110 = sst [smem:[#allocation9 + $0x2]] %s1832_s19 }
  0x19   :  { %112 = sst [smem:[#allocation9 + $0x3]] %s1833_s20 }
  0x1a   :  { %114 = sst [smem:[#allocation9 + $0x4]] %s1834_s22 }
  0x1b   :  { %116 = sst [smem:[#allocation9 + $0x5]] %s1832_s19 }
  0x1c   :  { %118 = sst [smem:[#allocation9 + $0x6]] %s1834_s22 }
  0x1d   :  { %120 = sst [smem:[#allocation9 + $0x7]] %s1833_s20 }
  0x1e   :  { %122 = sst [smem:[#allocation9 + $0x8]] %s1835_s24 }
  0x1f   :  { %124 = dma.general %s88_s14, 4096, %s103_s11, %s1842_s15, %s1843_s16, [#allocation9], %s1876_s23, 0  }
  0x20   :  { %v1808_v1 = vld [vmem:[%s3201_s1 + $0x4] ss:$8 sps:$4 sm:$0xff]   ;;  %v1810_v2 = vld [vmem:[%s3201_s1] ss:$8 sps:$4 sm:$0xff]   ;;  %v127_v6 = vld [vmem:[%s3200_s0 + $0x10] sm:$0xff] }
  0x21   :  { %v125_v3 = vld [vmem:[%s3200_s0] sm:$0xff]  ;;  %v126_v4 = vld [vmem:[%s3200_s0 + $0x8] sm:$0xff]  ;;  %186 = vmatprep.subr.bf16.mxu0 %v1808_v1  ;;  %v128_v7 = vld [vmem:[%s3200_s0 + $0x18] sm:$0xff] }
  0x22   :  { %v141_v5 = vpack.c.bf16 %v126_v4, %v125_v3  ;;  %187 = vmatpush1.bf16.msra.mxu0 %v1810_v2  ;;  %v142_v8 = vpack.c.bf16 %v128_v7, %v127_v6  ;;  %v129_v9 = vld [vmem:[%s3200_s0 + $0x20] sm:$0xff]  ;;  %v130_v10 = vld [vmem:[%s3200_s0 + $0x28] sm:$0xff]  ;;  %v131_v12 = vld [vmem:[%s3200_s0 + $0x30] sm:$0xff] }
  0x23   :  { %v143_v11 = vpack.c.bf16 %v130_v10, %v129_v9  ;;  %v132_v13 = vld [vmem:[%s3200_s0 + $0x38] sm:$0xff]  ;;  %v133_v15 = vld [vmem:[%s3200_s0 + $0x40] sm:$0xff]  ;;  %v134_v16 = vld [vmem:[%s3200_s0 + $0x48] sm:$0xff] }
  0x24   :  { %v144_v14 = vpack.c.bf16 %v132_v13, %v131_v12  ;;  %v145_v17 = vpack.c.bf16 %v134_v16, %v133_v15  ;;  %v135_v18 = vld [vmem:[%s3200_s0 + $0x50] sm:$0xff]  ;;  %v136_v19 = vld [vmem:[%s3200_s0 + $0x58] sm:$0xff]  ;;  %v137_v21 = vld [vmem:[%s3200_s0 + $0x60] sm:$0xff] }
  0x25   :  { %1743 = vmatmul.mubr.msk.bf16.vlgmr.msra.gmra.mrb[0].mxu0 %vm161_vm0, %v141_v5  ;;  %v146_v20 = vpack.c.bf16 %v136_v19, %v135_v18  ;;  %v138_v22 = vld [vmem:[%s3200_s0 + $0x68] sm:$0xff]  ;;  %v139_v24 = vld [vmem:[%s3200_s0 + $0x70] sm:$0xff]  ;;  %v140_v25 = vld [vmem:[%s3200_s0 + $0x78] sm:$0xff] }
  0x26   :  { %228 = vmatprep.mubr.bf16.mxu0 %v1830_v0  ;;  %v147_v23 = vpack.c.bf16 %v138_v22, %v137_v21  ;;  %v148_v26 = vpack.c.bf16 %v140_v25, %v139_v24 }
  0x2d   :  { %1744 = vmatmul.mubr.msk.bf16.gmra.mrb[4].mxu0 %vm161_vm0, %v142_v8 }
  0x2e   :  { %238 = vmatprep.mubr.bf16.mxu0 %v1830_v0 }
  0x35   :  { %1745 = vmatmul.mubr.msk.bf16.gmra.mrb[8].mxu0 %vm161_vm0, %v143_v11 }
  0x36   :  { %248 = vmatprep.mubr.bf16.mxu0 %v1830_v0 }
  0x3d   :  { %1746 = vmatmul.mubr.msk.bf16.gmra.mrb[12].mxu0 %vm161_vm0, %v144_v14 }
  0x3e   :  { %258 = vmatprep.mubr.bf16.mxu0 %v1830_v0 }
  0x45   :  { %1747 = vmatmul.mubr.msk.bf16.gmra.mrb[16].mxu0 %vm161_vm0, %v145_v17 }
  0x46   :  { %268 = vmatprep.mubr.bf16.mxu0 %v1830_v0 }
  0x4d   :  { %1748 = vmatmul.mubr.msk.bf16.gmra.mrb[20].mxu0 %vm161_vm0, %v146_v20 }
  0x4e   :  { %278 = vmatprep.mubr.bf16.mxu0 %v1830_v0 }
  0x55   :  { %1749 = vmatmul.mubr.msk.bf16.gmra.mrb[24].mxu0 %vm161_vm0, %v147_v23 }
  0x56   :  { %288 = vmatprep.mubr.bf16.mxu0 %v1830_v0 }
  0x5d   :  { %1750 = vmatmul.mubr.msk.bf16.gmra.mrb[28].mxu0 %vm161_vm0, %v148_v26 }
  0xf8   :  { %v1981_v27 = vpop.f32.mrb[0].mxu0 }
  0xf9   :  { %v1983_v28 = vpop.f32.mrb[1].mxu0  ;;  %v344_v30 = vmul.f32 %v1981_v27, %v1981_v27 }
  0xfa   :  { %v1985_v29 = vpop.f32.mrb[2].mxu0  ;;  %v345_v34 = vmul.f32 %v1983_v28, %v1983_v28 }
  0xfb   :  { %v299_v31 = vadd.f32 %v1985_v29, %v1981_v27  ;;  %v346_v32 = vmul.f32 %v1985_v29, %v1985_v29  ;;  %v1993_v33 = vpop.f32.mrb[3].mxu0 }
  0xfc   :  { %v320_v35 = vadd.f32 %v1993_v33, %v1983_v28  ;;  %v347_v36 = vmul.f32 %v1993_v33, %v1993_v33 }
  0xfd   :  { %v376_v37 = vadd.f32 %v346_v32, %v344_v30 }
  0xfe   :  { %v397_v38 = vadd.f32 %v347_v36, %v345_v34 }
 0x100   :  { %v2001_v39 = vpop.f32.mrb[4].mxu0 }
 0x101   :  { %v300_v40 = vadd.f32 %v299_v31, %v2001_v39  ;;  %v348_v41 = vmul.f32 %v2001_v39, %v2001_v39  ;;  %v2006_v42 = vpop.f32.mrb[5].mxu0 }
 0x102   :  { %v321_v43 = vadd.f32 %v320_v35, %v2006_v42  ;;  %v349_v44 = vmul.f32 %v2006_v42, %v2006_v42  ;;  %v2011_v45 = vpop.f32.mrb[6].mxu0 }
 0x103   :  { %v377_v46 = vadd.f32 %v376_v37, %v348_v41  ;;  %v301_v47 = vadd.f32 %v300_v40, %v2011_v45  ;;  %v350_v48 = vmul.f32 %v2011_v45, %v2011_v45  ;;  %v2016_v49 = vpop.f32.mrb[7].mxu0 }
 0x104   :  { %v398_v50 = vadd.f32 %v397_v38, %v349_v44  ;;  %v322_v51 = vadd.f32 %v321_v43, %v2016_v49  ;;  %v351_v52 = vmul.f32 %v2016_v49, %v2016_v49 }
 0x105   :  { %v378_v53 = vadd.f32 %v377_v46, %v350_v48 }
 0x106   :  { %v399_v54 = vadd.f32 %v398_v50, %v351_v52 }
 0x108   :  { %v2021_v55 = vpop.f32.mrb[8].mxu0 }
 0x109   :  { %v302_v56 = vadd.f32 %v301_v47, %v2021_v55  ;;  %v352_v57 = vmul.f32 %v2021_v55, %v2021_v55  ;;  %v2026_v58 = vpop.f32.mrb[9].mxu0 }
 0x10a   :  { %v323_v59 = vadd.f32 %v322_v51, %v2026_v58  ;;  %v353_v60 = vmul.f32 %v2026_v58, %v2026_v58  ;;  %v2031_v61 = vpop.f32.mrb[10].mxu0 }
 0x10b   :  { %v379_v62 = vadd.f32 %v378_v53, %v352_v57  ;;  %v303_v63 = vadd.f32 %v302_v56, %v2031_v61  ;;  %v354_v0 = vmul.f32 %v2031_v61, %v2031_v61  ;;  %v2036_v1 = vpop.f32.mrb[11].mxu0 }
 0x10c   :  { %v400_v2 = vadd.f32 %v399_v54, %v353_v60  ;;  %v324_v3 = vadd.f32 %v323_v59, %v2036_v1  ;;  %v355_v4 = vmul.f32 %v2036_v1, %v2036_v1 }
 0x10d   :  { %v380_v5 = vadd.f32 %v379_v62, %v354_v0 }
 0x10e   :  { %v401_v6 = vadd.f32 %v400_v2, %v355_v4 }
 0x110   :  { %v2041_v7 = vpop.f32.mrb[12].mxu0 }
 0x111   :  { %v304_v8 = vadd.f32 %v303_v63, %v2041_v7  ;;  %v356_v9 = vmul.f32 %v2041_v7, %v2041_v7  ;;  %v2046_v10 = vpop.f32.mrb[13].mxu0 }
 0x112   :  { %v325_v11 = vadd.f32 %v324_v3, %v2046_v10  ;;  %v357_v12 = vmul.f32 %v2046_v10, %v2046_v10  ;;  %v2051_v13 = vpop.f32.mrb[14].mxu0 }
 0x113   :  { %v381_v14 = vadd.f32 %v380_v5, %v356_v9  ;;  %v305_v15 = vadd.f32 %v304_v8, %v2051_v13  ;;  %v358_v16 = vmul.f32 %v2051_v13, %v2051_v13  ;;  %v2056_v17 = vpop.f32.mrb[15].mxu0 }
 0x114   :  { %v402_v18 = vadd.f32 %v401_v6, %v357_v12  ;;  %v326_v19 = vadd.f32 %v325_v11, %v2056_v17  ;;  %v359_v20 = vmul.f32 %v2056_v17, %v2056_v17 }
 0x115   :  { %v382_v21 = vadd.f32 %v381_v14, %v358_v16 }
 0x116   :  { %v403_v22 = vadd.f32 %v402_v18, %v359_v20 }
 0x118   :  { %v2061_v23 = vpop.f32.mrb[16].mxu0 }
 0x119   :  { %v306_v24 = vadd.f32 %v305_v15, %v2061_v23  ;;  %v360_v25 = vmul.f32 %v2061_v23, %v2061_v23  ;;  %v2066_v26 = vpop.f32.mrb[17].mxu0 }
 0x11a   :  { %v327_v30 = vadd.f32 %v326_v19, %v2066_v26  ;;  %v361_v31 = vmul.f32 %v2066_v26, %v2066_v26  ;;  %v2071_v32 = vpop.f32.mrb[18].mxu0 }
 0x11b   :  { %v383_v34 = vadd.f32 %v382_v21, %v360_v25  ;;  %v307_v35 = vadd.f32 %v306_v24, %v2071_v32  ;;  %v362_v36 = vmul.f32 %v2071_v32, %v2071_v32  ;;  %v2076_v37 = vpop.f32.mrb[19].mxu0 }
 0x11c   :  { %v404_v38 = vadd.f32 %v403_v22, %v361_v31  ;;  %v328_v40 = vadd.f32 %v327_v30, %v2076_v37  ;;  %v363_v41 = vmul.f32 %v2076_v37, %v2076_v37 }
 0x11d   :  { %v384_v43 = vadd.f32 %v383_v34, %v362_v36 }
 0x11e   :  { %v405_v44 = vadd.f32 %v404_v38, %v363_v41 }
 0x120   :  { %v2081_v46 = vpop.f32.mrb[20].mxu0 }
 0x121   :  { %v308_v47 = vadd.f32 %v307_v35, %v2081_v46  ;;  %v364_v48 = vmul.f32 %v2081_v46, %v2081_v46  ;;  %v2086_v50 = vpop.f32.mrb[21].mxu0 }
 0x122   :  { %v329_v51 = vadd.f32 %v328_v40, %v2086_v50  ;;  %v365_v52 = vmul.f32 %v2086_v50, %v2086_v50  ;;  %v2091_v53 = vpop.f32.mrb[22].mxu0 }
 0x123   :  { %v385_v54 = vadd.f32 %v384_v43, %v364_v48  ;;  %v309_v56 = vadd.f32 %v308_v47, %v2091_v53  ;;  %v366_v57 = vmul.f32 %v2091_v53, %v2091_v53  ;;  %v2096_v59 = vpop.f32.mrb[23].mxu0 }
 0x124   :  { %v406_v60 = vadd.f32 %v405_v44, %v365_v52  ;;  %v330_v62 = vadd.f32 %v329_v51, %v2096_v59  ;;  %v367_v63 = vmul.f32 %v2096_v59, %v2096_v59 }
 0x125   :  { %v386_v0 = vadd.f32 %v385_v54, %v366_v57 }
 0x126   :  { %v407_v2 = vadd.f32 %v406_v60, %v367_v63 }
 0x128   :  { %v2101_v3 = vpop.f32.mrb[24].mxu0 }
 0x129   :  { %v310_v4 = vadd.f32 %v309_v56, %v2101_v3  ;;  %v368_v5 = vmul.f32 %v2101_v3, %v2101_v3  ;;  %v2106_v6 = vpop.f32.mrb[25].mxu0 }
 0x12a   :  { %v331_v8 = vadd.f32 %v330_v62, %v2106_v6  ;;  %v369_v9 = vmul.f32 %v2106_v6, %v2106_v6  ;;  %v2111_v11 = vpop.f32.mrb[26].mxu0 }
 0x12b   :  { %v387_v12 = vadd.f32 %v386_v0, %v368_v5  ;;  %v311_v14 = vadd.f32 %v310_v4, %v2111_v11  ;;  %v370_v15 = vmul.f32 %v2111_v11, %v2111_v11  ;;  %v2116_v16 = vpop.f32.mrb[27].mxu0 }
 0x12c   :  { %v408_v18 = vadd.f32 %v407_v2, %v369_v9  ;;  %v332_v19 = vadd.f32 %v331_v8, %v2116_v16  ;;  %v371_v20 = vmul.f32 %v2116_v16, %v2116_v16 }
 0x12d   :  { %v388_v21 = vadd.f32 %v387_v12, %v370_v15 }
 0x12e   :  { %v409_v22 = vadd.f32 %v408_v18, %v371_v20 }
 0x130   :  { %v2121_v24 = vpop.f32.mrb[28].mxu0 }
 0x131   :  { %v312_v25 = vadd.f32 %v311_v14, %v2121_v24  ;;  %v372_v30 = vmul.f32 %v2121_v24, %v2121_v24  ;;  %v2126_v31 = vpop.f32.mrb[29].mxu0 }
 0x132   :  { %v333_v34 = vadd.f32 %v332_v19, %v2126_v31  ;;  %v373_v35 = vmul.f32 %v2126_v31, %v2126_v31  ;;  %v2131_v36 = vpop.f32.mrb[30].mxu0 }
 0x133   :  { %v389_v38 = vadd.f32 %v388_v21, %v372_v30  ;;  %v313_v40 = vadd.f32 %v312_v25, %v2131_v36  ;;  %v374_v41 = vmul.f32 %v2131_v36, %v2131_v36  ;;  %v2136_v43 = vpop.f32.mrb[31].mxu0 }
 0x134   :  { %v410_v44 = vadd.f32 %v409_v22, %v373_v35  ;;  %v334_v47 = vadd.f32 %v333_v34, %v2136_v43  ;;  %v375_v48 = vmul.f32 %v2136_v43, %v2136_v43 }
 0x135   :  { %v314_v51 = vrot.slane %v313_v40, 4  ;;  %v390_v52 = vadd.f32 %v389_v38, %v374_v41 }
 0x136   :  { %v335_v54 = vrot.slane %v334_v47, 4  ;;  %v411_v56 = vadd.f32 %v410_v44, %v375_v48 }
 0x137   :  { %v315_v57 = vadd.f32 %v314_v51, %v313_v40  ;;  %v391_v60 = vrot.slane %v390_v52, 4 }
 0x138   :  { %v336_v62 = vadd.f32 %v335_v54, %v334_v47  ;;  %v412_v63 = vrot.slane %v411_v56, 4 }
 0x139   :  { %v316_v0 = vrot.slane %v315_v57, 2  ;;  %v392_v2 = vadd.f32 %v391_v60, %v390_v52 }
 0x13a   :  { %v337_v4 = vrot.slane %v336_v62, 2  ;;  %v413_v5 = vadd.f32 %v412_v63, %v411_v56 }
 0x13b   :  { %v317_v8 = vadd.f32 %v316_v0, %v315_v57  ;;  %v393_v9 = vrot.slane %v392_v2, 2  ;;  %v439_v0 = vlaneseq }
 0x13c   :  { %v338_v12 = vadd.f32 %v337_v4, %v336_v62  ;;  %v414_v14 = vrot.slane %v413_v5, 2  ;;  %v1844_v62 = vmov 1966171168  }
 0x13d   :  { %v318_v15 = vrot.slane %v317_v8, 1  ;;  %v394_v18 = vadd.f32 %v393_v9, %v392_v2  ;;  %v437_v63 = vunpack.c.l.s4 %v1844_v62  ;;  %v440_v4 = vshrl.u32 %v439_v0, 7 }
 0x13e   :  { %v339_v19 = vrot.slane %v338_v12, 1  ;;  %v415_v20 = vadd.f32 %v414_v14, %v413_v5 }
 0x13f   :  { %v319_v21 = vadd.f32 %v318_v15, %v317_v8  ;;  %v395_v22 = vrot.slane %v394_v18, 1  ;;  %v438_v2 = vunpack.c.0.s8 %v437_v63  ;;  %v426_v15 = vld [vmem:[%s3202_s2] ss:$8 sm:$0x3] }
 0x140   :  { %v340_v25 = vadd.f32 %v339_v19, %v338_v12  ;;  %v416_v30 = vrot.slane %v415_v20, 1  ;;  %v2148_v19 = vsub.s32 0, %v440_v4 }
 0x141   :  { %v342_v34 = vmul.f32 0.0078125, %v319_v21  ;;  %v396_v35 = vadd.f32 %v395_v22, %v394_v18  ;;  %v2141_v8 = vsub.s32 %v438_v2, %v440_v4 }
 0x142   :  { %v343_v38 = vmul.f32 0.0078125, %v340_v25  ;;  %v417_v40 = vadd.f32 %v416_v30, %v415_v20  ;;  %v2150_v20 = vsub.s32 1, %v440_v4 }
 0x143   :  { %v418_v41 = vmul.f32 0.0078125, %v396_v35  ;;  %v420_v44 = vmul.f32 %v342_v34, %v342_v34 }
 0x144   :  { %v419_v47 = vmul.f32 0.0078125, %v417_v40  ;;  %v421_v48 = vmul.f32 %v343_v38, %v343_v38 }
 0x145   :  { %v422_v51 = vsub.f32 %v418_v41, %v420_v44 }
 0x146   :  { %v423_v52 = vsub.f32 %v419_v47, %v421_v48 }
 0x147   :  { %v424_v54 = vmax.f32 %v422_v51, 0.0 }
 0x148   :  { %v425_v56 = vmax.f32 %v423_v52, 0.0 }
 0x149   :  { %v429_v57 = vadd.f32 1e-05, %v424_v54 }
 0x14a   :  { %v430_v60 = vadd.f32 1e-05, %v425_v56 }
 0x14b   :  { %1811 = vrsqrt.f32 %v429_v57 }
 0x14c   :  { %1813 = vrsqrt.f32 %v430_v60 }
 0x155   :  { %v1812_v5 = vpop.eup %1811 }
 0x156   :  { %v1814_v9 = vpop.eup %1813 }
 0x157   :  { %v435_v12 = vcombine.low %v1812_v5, %v1814_v9 }
 0x159   :  { %v442_v14 = vrot.slane %v435_v12, %v2141_v8 }
 0x15b   :  { %v449_v18 = vrot.slane %v442_v14, %v2141_v8 }
 0x15d   :  { %v451_v21 = vmul.f32 %v449_v18, %v426_v15 }
 0x15f   :  { %v456_v22 = vrot.slane %v451_v21, %v2148_v19  ;;  %v460_v25 = vrot.slane %v451_v21, %v2150_v20 }
 0x161   :  { %v463_v30 = vmul.f32 %v456_v22, %v342_v34  ;;  %v464_v35 = vmul.f32 %v460_v25, %v343_v38  ;;  %v484_v40 = vmul.f32 %v456_v22, %v1981_v27  ;;  %v485_v41 = vmul.f32 %v460_v25, %v1983_v28 }
 0x162   :  { %v486_v44 = vmul.f32 %v456_v22, %v1985_v29  ;;  %v487_v47 = vmul.f32 %v460_v25, %v1993_v33  ;;  %v488_v48 = vmul.f32 %v456_v22, %v2001_v39  ;;  %v489_v51 = vmul.f32 %v460_v25, %v2006_v42 }
 0x163   :  { %v467_v52 = vcombine.low %v463_v30, %v464_v35  ;;  %v490_v54 = vmul.f32 %v456_v22, %v2011_v45  ;;  %v491_v56 = vmul.f32 %v460_v25, %v2016_v49  ;;  %v492_v34 = vmul.f32 %v456_v22, %v2021_v55  ;;  %v1751_v49 = vld [vmem:[%s3202_s2 + $0x3] ss:$8 sm:$0x3] }
 0x164   :  { %v493_v38 = vmul.f32 %v460_v25, %v2026_v58  ;;  %v494_v27 = vmul.f32 %v456_v22, %v2031_v61  ;;  %v495_v28 = vmul.f32 %v460_v25, %v2036_v1  ;;  %v496_v29 = vmul.f32 %v456_v22, %v2041_v7 }
 0x165   :  { %v474_v33 = vrot.slane %v467_v52, %v2141_v8  ;;  %v497_v39 = vmul.f32 %v460_v25, %v2046_v10  ;;  %v498_v42 = vmul.f32 %v456_v22, %v2051_v13  ;;  %v499_v45 = vmul.f32 %v460_v25, %v2056_v17 }
 0x166   :  { %v500_v55 = vmul.f32 %v456_v22, %v2061_v23  ;;  %v501_v58 = vmul.f32 %v460_v25, %v2066_v26  ;;  %v502_v61 = vmul.f32 %v456_v22, %v2071_v32  ;;  %v503_v1 = vmul.f32 %v460_v25, %v2076_v37 }
 0x167   :  { %v481_v7 = vrot.slane %v474_v33, %v2141_v8  ;;  %v504_v10 = vmul.f32 %v456_v22, %v2081_v46  ;;  %v505_v13 = vmul.f32 %v460_v25, %v2086_v50  ;;  %v506_v17 = vmul.f32 %v456_v22, %v2091_v53 }
 0x168   :  { %v507_v57 = vmul.f32 %v460_v25, %v2096_v59  ;;  %v508_v60 = vmul.f32 %v456_v22, %v2101_v3  ;;  %v509_v23 = vmul.f32 %v460_v25, %v2106_v6  ;;  %v510_v26 = vmul.f32 %v456_v22, %v2111_v11 }
 0x169   :  { %v483_v62 = vsub.f32 %v1751_v49, %v481_v7  ;;  %v511_v32 = vmul.f32 %v460_v25, %v2116_v16  ;;  %v512_v37 = vmul.f32 %v456_v22, %v2121_v24  ;;  %v513_v63 = vmul.f32 %v460_v25, %v2126_v31 }
 0x16a   :  { %v514_v46 = vmul.f32 %v456_v22, %v2131_v36  ;;  %v515_v50 = vmul.f32 %v460_v25, %v2136_v43 }
 0x16b   :  { %v520_v53 = vrot.slane %v483_v62, %v2148_v19  ;;  %v524_v59 = vrot.slane %v483_v62, %v2150_v20 }
 0x16d   :  { %v2193_v3 = vadd.f32 %v520_v53, %v484_v40  ;;  %v2195_v6 = vadd.f32 %v524_v59, %v485_v41  ;;  %v2197_v11 = vadd.f32 %v520_v53, %v486_v44  ;;  %v2199_v0 = vadd.f32 %v524_v59, %v487_v47 }
 0x16e   :  { %v2201_v16 = vadd.f32 %v520_v53, %v488_v48  ;;  %v2203_v24 = vadd.f32 %v524_v59, %v489_v51  ;;  %v2205_v31 = vadd.f32 %v520_v53, %v490_v54  ;;  %v2207_v36 = vadd.f32 %v524_v59, %v491_v56 }
 0x16f   :  { %v2209_v43 = vadd.f32 %v520_v53, %v492_v34  ;;  %v2211_v2 = vadd.f32 %v524_v59, %v493_v38  ;;  %v2213_v4 = vadd.f32 %v520_v53, %v494_v27  ;;  %v2215_v5 = vadd.f32 %v524_v59, %v495_v28 }
 0x170   :  { %v2217_v9 = vadd.f32 %v520_v53, %v496_v29  ;;  %v2219_v12 = vadd.f32 %v524_v59, %v497_v39  ;;  %v2221_v14 = vadd.f32 %v520_v53, %v498_v42  ;;  %v2223_v15 = vadd.f32 %v524_v59, %v499_v45 }
 0x171   :  { %v2225_v18 = vadd.f32 %v520_v53, %v500_v55  ;;  %v2227_v21 = vadd.f32 %v524_v59, %v501_v58  ;;  %v2229_v22 = vadd.f32 %v520_v53, %v502_v61  ;;  %v2231_v25 = vadd.f32 %v524_v59, %v503_v1 }
 0x172   :  { %v2233_v30 = vadd.f32 %v520_v53, %v504_v10  ;;  %v2235_v35 = vadd.f32 %v524_v59, %v505_v13  ;;  %v2237_v40 = vadd.f32 %v520_v53, %v506_v17  ;;  %v2239_v41 = vadd.f32 %v524_v59, %v507_v57 }
 0x173   :  { %v2241_v44 = vadd.f32 %v520_v53, %v508_v60  ;;  %v2243_v47 = vadd.f32 %v524_v59, %v509_v23  ;;  %v2245_v48 = vadd.f32 %v520_v53, %v510_v26  ;;  %v2247_v51 = vadd.f32 %v524_v59, %v511_v32 }
 0x174   :  { %v2249_v52 = vadd.f32 %v520_v53, %v512_v37  ;;  %v2251_v54 = vadd.f32 %v524_v59, %v513_v63  ;;  %v2253_v56 = vadd.f32 %v520_v53, %v514_v46  ;;  %v2255_v34 = vadd.f32 %v524_v59, %v515_v50 }
 0x175   :  { %v559_v38 = vmax.f32 %v2193_v3, 0.0  ;;  %v560_v27 = vmax.f32 %v2195_v6, 0.0  ;;  %v561_v28 = vmax.f32 %v2197_v11, 0.0  ;;  %v562_v29 = vmax.f32 %v2199_v0, 0.0 }
 0x176   :  { %v563_v33 = vmax.f32 %v2201_v16, 0.0  ;;  %v564_v39 = vmax.f32 %v2203_v24, 0.0  ;;  %v565_v42 = vmax.f32 %v2205_v31, 0.0  ;;  %v566_v45 = vmax.f32 %v2207_v36, 0.0 }
 0x177   :  { %v567_v49 = vmax.f32 %v2209_v43, 0.0  ;;  %v568_v55 = vmax.f32 %v2211_v2, 0.0  ;;  %v569_v58 = vmax.f32 %v2213_v4, 0.0  ;;  %v570_v61 = vmax.f32 %v2215_v5, 0.0 }
 0x178   :  { %v571_v1 = vmax.f32 %v2217_v9, 0.0  ;;  %v572_v7 = vmax.f32 %v2219_v12, 0.0  ;;  %v573_v10 = vmax.f32 %v2221_v14, 0.0  ;;  %v574_v13 = vmax.f32 %v2223_v15, 0.0 }
 0x179   :  { %v575_v17 = vmax.f32 %v2225_v18, 0.0  ;;  %v576_v57 = vmax.f32 %v2227_v21, 0.0  ;;  %v577_v60 = vmax.f32 %v2229_v22, 0.0  ;;  %v578_v23 = vmax.f32 %v2231_v25, 0.0 }
 0x17a   :  { %v584_v46 = vmax.f32 %v2243_v47, 0.0 }
 0x17b   :  { %1823 = dma.done.wait [#allocation3], 4096 }
 0x17c   :  { %1824 = vsyncadd [#allocation3], 4294963200  ;;  %v596_v32 = vpack.c.bf16 %v562_v29, %v560_v27  ;;  %v612_v37 = vld [vmem:[#allocation2 + $0x8] sm:$0xff]  ;;  %v611_v63 = vld [vmem:[#allocation2] sm:$0xff]  ;;  %v600_v3 = vpack.c.bf16 %v570_v61, %v568_v55  ;;  %v599_v11 = vpack.c.bf16 %v569_v58, %v567_v49  ;;  %v602_v16 = vpack.c.bf16 %v574_v13, %v572_v7 }
 0x17d   :  { %v614_v62 = vld [vmem:[#allocation2 + $0x18] sm:$0xff]  ;;  %643 = vmatprep.subr.bf16.mxu1 %v612_v37  ;;  %v613_v50 = vld [vmem:[#allocation2 + $0x10] sm:$0xff]  ;;  %v616_v53 = vld [vmem:[#allocation2 + $0x28] sm:$0xff]  ;;  %v601_v24 = vpack.c.bf16 %v573_v10, %v571_v1  ;;  %v604_v31 = vpack.c.bf16 %v578_v23, %v576_v57  ;;  %v603_v36 = vpack.c.bf16 %v577_v60, %v575_v17  ;;  %v3205_v43 = vmax.f32 %v2235_v35, 0.0 }
 0x17e   :  { %675 = vmatprep.mubr.bf16.mxu1 %v596_v32  ;;  %644 = vmatpush1.bf16.msra.mxu1 %v611_v63  ;;  %v615_v59 = vld [vmem:[#allocation2 + $0x20] sm:$0xff]  ;;  %v618_v6 = vld [vmem:[#allocation2 + $0x38] sm:$0xff]  ;;  %v617_v0 = vld [vmem:[#allocation2 + $0x30] sm:$0xff]  ;;  %v3206_v2 = vmax.f32 %v2239_v41, 0.0  ;;  %v3207_v5 = vmax.f32 %v2233_v30, 0.0  ;;  %v3208_v9 = vmax.f32 %v2237_v40, 0.0 }
 0x17f   :  { %645 = vmatprep.subr.bf16.mxu1 %v614_v62  ;;  %v620_v26 = vld [vmem:[#allocation2 + $0x48] sm:$0xff]  ;;  %v619_v27 = vld [vmem:[#allocation2 + $0x40] sm:$0xff]  ;;  %v622_v29 = vld [vmem:[#allocation2 + $0x58] sm:$0xff]  ;;  %v3209_v14 = vmax.f32 %v2247_v51, 0.0  ;;  %v3210_v18 = vmax.f32 %v2241_v44, 0.0  ;;  %v3211_v21 = vmax.f32 %v2245_v48, 0.0 }
 0x180   :  { %v621_v32 = vld [vmem:[#allocation2 + $0x50] sm:$0xff]  ;;  %v624_v37 = vld [vmem:[#allocation2 + $0x68] sm:$0xff]  ;;  %v623_v62 = vld [vmem:[#allocation2 + $0x60] sm:$0xff]  ;;  %v606_v4 = vpack.c.bf16 %v3206_v2, %v3205_v43  ;;  %v605_v12 = vpack.c.bf16 %v3208_v9, %v3207_v5  ;;  %v3212_v25 = vmax.f32 %v2251_v54, 0.0  ;;  %v3213_v35 = vmax.f32 %v2255_v34, 0.0 }
 0x181   :  { %v626_v63 = vld [vmem:[#allocation2 + $0x78] sm:$0xff]  ;;  %v608_v15 = vpack.c.bf16 %v3209_v14, %v584_v46  ;;  %v607_v22 = vpack.c.bf16 %v3211_v21, %v3210_v18  ;;  %v3214_v40 = vmax.f32 %v2249_v52, 0.0  ;;  %v3215_v41 = vmax.f32 %v2253_v56, 0.0 }
 0x182   :  { %646 = vmatpush1.bf16.msra.mxu1 %v613_v50  ;;  %v625_v50 = vld [vmem:[#allocation2 + $0x70] sm:$0xff]  ;;  %v610_v30 = vpack.c.bf16 %v3213_v35, %v3212_v25 }
 0x183   :  { %647 = vmatprep.subr.bf16.mxu1 %v616_v53  ;;  %v628_v53 = vld [vmem:[#allocation2 + $0x88] sm:$0xff]  ;;  %v609_v47 = vpack.c.bf16 %v3215_v41, %v3214_v40 }
 0x186   :  { %648 = vmatpush1.bf16.msra.mxu1 %v615_v59  ;;  %v627_v59 = vld [vmem:[#allocation2 + $0x80] sm:$0xff] }
 0x187   :  { %649 = vmatprep.subr.bf16.mxu1 %v618_v6  ;;  %v630_v6 = vld [vmem:[#allocation2 + $0x98] sm:$0xff] }
 0x18a   :  { %650 = vmatpush1.bf16.msra.mxu1 %v617_v0  ;;  %v632_v0 = vld [vmem:[#allocation2 + $0xa8] sm:$0xff] }
 0x18b   :  { %651 = vmatprep.subr.bf16.mxu1 %v620_v26  ;;  %v629_v26 = vld [vmem:[#allocation2 + $0x90] sm:$0xff] }
 0x18e   :  { %652 = vmatpush1.bf16.msra.mxu1 %v619_v27  ;;  %v631_v27 = vld [vmem:[#allocation2 + $0xa0] sm:$0xff] }
 0x18f   :  { %653 = vmatprep.subr.bf16.mxu1 %v622_v29  ;;  %v634_v29 = vld [vmem:[#allocation2 + $0xb8] sm:$0xff] }
 0x192   :  { %654 = vmatpush1.bf16.msra.mxu1 %v621_v32  ;;  %v633_v32 = vld [vmem:[#allocation2 + $0xb0] sm:$0xff] }
 0x193   :  { %655 = vmatprep.subr.bf16.mxu1 %v624_v37  ;;  %v636_v37 = vld [vmem:[#allocation2 + $0xc8] sm:$0xff] }
 0x196   :  { %656 = vmatpush1.bf16.msra.mxu1 %v623_v62  ;;  %v635_v62 = vld [vmem:[#allocation2 + $0xc0] sm:$0xff] }
 0x197   :  { %657 = vmatprep.subr.bf16.mxu1 %v626_v63  ;;  %v638_v63 = vld [vmem:[#allocation2 + $0xd8] sm:$0xff] }
 0x19a   :  { %658 = vmatpush1.bf16.msra.mxu1 %v625_v50  ;;  %v637_v50 = vld [vmem:[#allocation2 + $0xd0] sm:$0xff] }
 0x19b   :  { %659 = vmatprep.subr.bf16.mxu1 %v628_v53  ;;  %v640_v53 = vld [vmem:[#allocation2 + $0xe8] sm:$0xff] }
 0x19e   :  { %660 = vmatpush1.bf16.msra.mxu1 %v627_v59  ;;  %v639_v59 = vld [vmem:[#allocation2 + $0xe0] sm:$0xff] }
 0x19f   :  { %661 = vmatprep.subr.bf16.mxu1 %v630_v6  ;;  %v642_v6 = vld [vmem:[#allocation2 + $0xf8] sm:$0xff] }
 0x1a2   :  { %662 = vmatpush1.bf16.msra.mxu1 %v629_v26  ;;  %v641_v26 = vld [vmem:[#allocation2 + $0xf0] sm:$0xff] }
 0x1a3   :  { %663 = vmatprep.subr.bf16.mxu1 %v632_v0  ;;  %v595_v0 = vpack.c.bf16 %v561_v28, %v559_v38 }
 0x1a6   :  { %664 = vmatpush1.bf16.msra.mxu1 %v631_v27  ;;  %v598_v27 = vpack.c.bf16 %v566_v45, %v564_v39 }
 0x1a7   :  { %665 = vmatprep.subr.bf16.mxu1 %v634_v29  ;;  %v597_v29 = vpack.c.bf16 %v565_v42, %v563_v33 }
 0x1aa   :  { %666 = vmatpush1.bf16.msra.mxu1 %v633_v32 }
 0x1ab   :  { %667 = vmatprep.subr.bf16.mxu1 %v636_v37 }
 0x1ae   :  { %668 = vmatpush1.bf16.msra.mxu1 %v635_v62 }
 0x1af   :  { %669 = vmatprep.subr.bf16.mxu1 %v638_v63 }
 0x1b2   :  { %670 = vmatpush1.bf16.msra.mxu1 %v637_v50 }
 0x1b3   :  { %671 = vmatprep.subr.bf16.mxu1 %v640_v53 }
 0x1b6   :  { %672 = vmatpush1.bf16.msra.mxu1 %v639_v59 }
 0x1b7   :  { %673 = vmatprep.subr.bf16.mxu1 %v642_v6 }
 0x1ba   :  { %674 = vmatpush1.bf16.msra.mxu1 %v641_v26 }
 0x1bd   :  { %676 = vmatmul.mubr.bf16.vlgmr.msra.gmra.mrb[0].mxu1 %v595_v0 }
 0x1be   :  { %685 = vmatprep.mubr.bf16.mxu1 %v598_v27 }
 0x1c5   :  { %686 = vmatmul.mubr.bf16.gmra.mrb[4].mxu1 %v597_v29 }
 0x1c6   :  { %695 = vmatprep.mubr.bf16.mxu1 %v600_v3 }
 0x1cd   :  { %696 = vmatmul.mubr.bf16.gmra.mrb[8].mxu1 %v599_v11 }
 0x1ce   :  { %705 = vmatprep.mubr.bf16.mxu1 %v602_v16 }
 0x1d5   :  { %706 = vmatmul.mubr.bf16.gmra.mrb[12].mxu1 %v601_v24 }
 0x1d6   :  { %715 = vmatprep.mubr.bf16.mxu1 %v604_v31 }
 0x1dd   :  { %716 = vmatmul.mubr.bf16.gmra.mrb[16].mxu1 %v603_v36 }
 0x1de   :  { %725 = vmatprep.mubr.bf16.mxu1 %v606_v4 }
 0x1e5   :  { %726 = vmatmul.mubr.bf16.gmra.mrb[20].mxu1 %v605_v12 }
 0x1e6   :  { %735 = vmatprep.mubr.bf16.mxu1 %v608_v15 }
 0x1ed   :  { %736 = vmatmul.mubr.bf16.gmra.mrb[24].mxu1 %v607_v22 }
 0x1ee   :  { %745 = vmatprep.mubr.bf16.mxu1 %v610_v30 }
 0x1f5   :  { %746 = vmatmul.mubr.bf16.gmra.mrb[28].mxu1 %v609_v47 }
 0x290   :  { %v2349_v51 = vpop.f32.mrb[0].mxu1 }
 0x291   :  { %v2351_v38 = vpop.f32.mrb[1].mxu1  ;;  %v800_v48 = vmul.f32 %v2349_v51, %v2349_v51 }
 0x292   :  { %v2353_v44 = vpop.f32.mrb[2].mxu1  ;;  %v801_v56 = vmul.f32 %v2351_v38, %v2351_v38 }
 0x293   :  { %v756_v54 = vadd.f32 %v2353_v44, %v2349_v51  ;;  %v802_v34 = vmul.f32 %v2353_v44, %v2353_v44  ;;  %v2361_v52 = vpop.f32.mrb[3].mxu1 }
 0x294   :  { %v777_v28 = vadd.f32 %v2361_v52, %v2351_v38  ;;  %v803_v33 = vmul.f32 %v2361_v52, %v2361_v52 }
 0x295   :  { %v832_v39 = vadd.f32 %v802_v34, %v800_v48 }
 0x296   :  { %v853_v42 = vadd.f32 %v803_v33, %v801_v56 }
 0x298   :  { %v2369_v45 = vpop.f32.mrb[4].mxu1 }
 0x299   :  { %v757_v49 = vadd.f32 %v756_v54, %v2369_v45  ;;  %v804_v55 = vmul.f32 %v2369_v45, %v2369_v45  ;;  %v2374_v58 = vpop.f32.mrb[5].mxu1 }
 0x29a   :  { %v778_v61 = vadd.f32 %v777_v28, %v2374_v58  ;;  %v805_v1 = vmul.f32 %v2374_v58, %v2374_v58  ;;  %v2379_v7 = vpop.f32.mrb[6].mxu1 }
 0x29b   :  { %v833_v10 = vadd.f32 %v832_v39, %v804_v55  ;;  %v758_v13 = vadd.f32 %v757_v49, %v2379_v7  ;;  %v806_v17 = vmul.f32 %v2379_v7, %v2379_v7  ;;  %v2384_v57 = vpop.f32.mrb[7].mxu1 }
 0x29c   :  { %v854_v60 = vadd.f32 %v853_v42, %v805_v1  ;;  %v779_v23 = vadd.f32 %v778_v61, %v2384_v57  ;;  %v807_v46 = vmul.f32 %v2384_v57, %v2384_v57 }
 0x29d   :  { %v834_v32 = vadd.f32 %v833_v10, %v806_v17 }
 0x29e   :  { %v855_v37 = vadd.f32 %v854_v60, %v807_v46 }
 0x2a0   :  { %v2389_v62 = vpop.f32.mrb[8].mxu1 }
 0x2a1   :  { %v759_v63 = vadd.f32 %v758_v13, %v2389_v62  ;;  %v808_v50 = vmul.f32 %v2389_v62, %v2389_v62  ;;  %v2394_v53 = vpop.f32.mrb[9].mxu1 }
 0x2a2   :  { %v780_v59 = vadd.f32 %v779_v23, %v2394_v53  ;;  %v809_v6 = vmul.f32 %v2394_v53, %v2394_v53  ;;  %v2399_v26 = vpop.f32.mrb[10].mxu1 }
 0x2a3   :  { %v835_v0 = vadd.f32 %v834_v32, %v808_v50  ;;  %v760_v27 = vadd.f32 %v759_v63, %v2399_v26  ;;  %v810_v29 = vmul.f32 %v2399_v26, %v2399_v26  ;;  %v2404_v3 = vpop.f32.mrb[11].mxu1 }
 0x2a4   :  { %v856_v11 = vadd.f32 %v855_v37, %v809_v6  ;;  %v781_v16 = vadd.f32 %v780_v59, %v2404_v3  ;;  %v811_v24 = vmul.f32 %v2404_v3, %v2404_v3 }
 0x2a5   :  { %v836_v31 = vadd.f32 %v835_v0, %v810_v29 }
 0x2a6   :  { %v857_v36 = vadd.f32 %v856_v11, %v811_v24 }
 0x2a8   :  { %v2409_v43 = vpop.f32.mrb[12].mxu1 }
 0x2a9   :  { %v761_v2 = vadd.f32 %v760_v27, %v2409_v43  ;;  %v812_v4 = vmul.f32 %v2409_v43, %v2409_v43  ;;  %v2414_v5 = vpop.f32.mrb[13].mxu1 }
 0x2aa   :  { %v782_v9 = vadd.f32 %v781_v16, %v2414_v5  ;;  %v813_v12 = vmul.f32 %v2414_v5, %v2414_v5  ;;  %v2419_v14 = vpop.f32.mrb[14].mxu1 }
 0x2ab   :  { %v837_v15 = vadd.f32 %v836_v31, %v812_v4  ;;  %v762_v18 = vadd.f32 %v761_v2, %v2419_v14  ;;  %v814_v21 = vmul.f32 %v2419_v14, %v2419_v14  ;;  %v2424_v22 = vpop.f32.mrb[15].mxu1 }
 0x2ac   :  { %v858_v25 = vadd.f32 %v857_v36, %v813_v12  ;;  %v783_v35 = vadd.f32 %v782_v9, %v2424_v22  ;;  %v815_v30 = vmul.f32 %v2424_v22, %v2424_v22 }
 0x2ad   :  { %v838_v40 = vadd.f32 %v837_v15, %v814_v21 }
 0x2ae   :  { %v859_v41 = vadd.f32 %v858_v25, %v815_v30 }
 0x2b0   :  { %v2429_v47 = vpop.f32.mrb[16].mxu1 }
 0x2b1   :  { %v763_v48 = vadd.f32 %v762_v18, %v2429_v47  ;;  %v816_v54 = vmul.f32 %v2429_v47, %v2429_v47  ;;  %v2434_v34 = vpop.f32.mrb[17].mxu1 }
 0x2b2   :  { %v784_v56 = vadd.f32 %v783_v35, %v2434_v34  ;;  %v817_v28 = vmul.f32 %v2434_v34, %v2434_v34  ;;  %v2439_v33 = vpop.f32.mrb[18].mxu1 }
 0x2b3   :  { %v839_v39 = vadd.f32 %v838_v40, %v816_v54  ;;  %v764_v42 = vadd.f32 %v763_v48, %v2439_v33  ;;  %v818_v49 = vmul.f32 %v2439_v33, %v2439_v33  ;;  %v2444_v55 = vpop.f32.mrb[19].mxu1 }
 0x2b4   :  { %v860_v61 = vadd.f32 %v859_v41, %v817_v28  ;;  %v785_v1 = vadd.f32 %v784_v56, %v2444_v55  ;;  %v819_v10 = vmul.f32 %v2444_v55, %v2444_v55 }
 0x2b5   :  { %v840_v13 = vadd.f32 %v839_v39, %v818_v49 }
 0x2b6   :  { %v861_v17 = vadd.f32 %v860_v61, %v819_v10 }
 0x2b8   :  { %v2449_v60 = vpop.f32.mrb[20].mxu1 }
 0x2b9   :  { %v765_v23 = vadd.f32 %v764_v42, %v2449_v60  ;;  %v820_v46 = vmul.f32 %v2449_v60, %v2449_v60  ;;  %v2454_v32 = vpop.f32.mrb[21].mxu1 }
 0x2ba   :  { %v786_v37 = vadd.f32 %v785_v1, %v2454_v32  ;;  %v821_v63 = vmul.f32 %v2454_v32, %v2454_v32  ;;  %v2459_v50 = vpop.f32.mrb[22].mxu1 }
 0x2bb   :  { %v841_v59 = vadd.f32 %v840_v13, %v820_v46  ;;  %v766_v6 = vadd.f32 %v765_v23, %v2459_v50  ;;  %v822_v0 = vmul.f32 %v2459_v50, %v2459_v50  ;;  %v2464_v27 = vpop.f32.mrb[23].mxu1 }
 0x2bc   :  { %v862_v29 = vadd.f32 %v861_v17, %v821_v63  ;;  %v787_v11 = vadd.f32 %v786_v37, %v2464_v27  ;;  %v823_v16 = vmul.f32 %v2464_v27, %v2464_v27 }
 0x2bd   :  { %v842_v24 = vadd.f32 %v841_v59, %v822_v0 }
 0x2be   :  { %v863_v31 = vadd.f32 %v862_v29, %v823_v16 }
 0x2c0   :  { %v2469_v36 = vpop.f32.mrb[24].mxu1 }
 0x2c1   :  { %v767_v2 = vadd.f32 %v766_v6, %v2469_v36  ;;  %v824_v4 = vmul.f32 %v2469_v36, %v2469_v36  ;;  %v2474_v9 = vpop.f32.mrb[25].mxu1 }
 0x2c2   :  { %v788_v12 = vadd.f32 %v787_v11, %v2474_v9  ;;  %v825_v15 = vmul.f32 %v2474_v9, %v2474_v9  ;;  %v2479_v18 = vpop.f32.mrb[26].mxu1 }
 0x2c3   :  { %v843_v21 = vadd.f32 %v842_v24, %v824_v4  ;;  %v768_v25 = vadd.f32 %v767_v2, %v2479_v18  ;;  %v826_v35 = vmul.f32 %v2479_v18, %v2479_v18  ;;  %v2484_v30 = vpop.f32.mrb[27].mxu1 }
 0x2c4   :  { %v864_v40 = vadd.f32 %v863_v31, %v825_v15  ;;  %v789_v41 = vadd.f32 %v788_v12, %v2484_v30  ;;  %v827_v48 = vmul.f32 %v2484_v30, %v2484_v30 }
 0x2c5   :  { %v844_v54 = vadd.f32 %v843_v21, %v826_v35 }
 0x2c6   :  { %v865_v56 = vadd.f32 %v864_v40, %v827_v48 }
 0x2c8   :  { %v2489_v28 = vpop.f32.mrb[28].mxu1 }
 0x2c9   :  { %v769_v39 = vadd.f32 %v768_v25, %v2489_v28  ;;  %v828_v42 = vmul.f32 %v2489_v28, %v2489_v28  ;;  %v2494_v49 = vpop.f32.mrb[29].mxu1 }
 0x2ca   :  { %v790_v61 = vadd.f32 %v789_v41, %v2494_v49  ;;  %v829_v1 = vmul.f32 %v2494_v49, %v2494_v49  ;;  %v2499_v10 = vpop.f32.mrb[30].mxu1 }
 0x2cb   :  { %v845_v13 = vadd.f32 %v844_v54, %v828_v42  ;;  %v770_v17 = vadd.f32 %v769_v39, %v2499_v10  ;;  %v830_v23 = vmul.f32 %v2499_v10, %v2499_v10  ;;  %v2504_v46 = vpop.f32.mrb[31].mxu1 }
 0x2cc   :  { %v866_v37 = vadd.f32 %v865_v56, %v829_v1  ;;  %v791_v63 = vadd.f32 %v790_v61, %v2504_v46  ;;  %v831_v59 = vmul.f32 %v2504_v46, %v2504_v46 }
 0x2cd   :  { %v771_v6 = vrot.slane %v770_v17, 4  ;;  %v846_v0 = vadd.f32 %v845_v13, %v830_v23 }
 0x2ce   :  { %v792_v29 = vrot.slane %v791_v63, 4  ;;  %v867_v11 = vadd.f32 %v866_v37, %v831_v59 }
 0x2cf   :  { %v772_v16 = vadd.f32 %v771_v6, %v770_v17  ;;  %v847_v24 = vrot.slane %v846_v0, 4 }
 0x2d0   :  { %v793_v31 = vadd.f32 %v792_v29, %v791_v63  ;;  %v868_v2 = vrot.slane %v867_v11, 4 }
 0x2d1   :  { %v773_v4 = vrot.slane %v772_v16, 2  ;;  %v848_v12 = vadd.f32 %v847_v24, %v846_v0 }
 0x2d2   :  { %v794_v15 = vrot.slane %v793_v31, 2  ;;  %v869_v21 = vadd.f32 %v868_v2, %v867_v11 }
 0x2d3   :  { %v774_v25 = vadd.f32 %v773_v4, %v772_v16  ;;  %v849_v35 = vrot.slane %v848_v12, 2 }
 0x2d4   :  { %v795_v40 = vadd.f32 %v794_v15, %v793_v31  ;;  %v870_v41 = vrot.slane %v869_v21, 2 }
 0x2d5   :  { %v775_v48 = vrot.slane %v774_v25, 1  ;;  %v850_v54 = vadd.f32 %v849_v35, %v848_v12  ;;  %v1752_v35 = vld [vmem:[%s3202_s2 + $0x1] ss:$8 sm:$0x3] }
 0x2d6   :  { %v796_v56 = vrot.slane %v795_v40, 1  ;;  %v871_v39 = vadd.f32 %v870_v41, %v869_v21 }
 0x2d7   :  { %v776_v42 = vadd.f32 %v775_v48, %v774_v25  ;;  %v851_v61 = vrot.slane %v850_v54, 1 }
 0x2d8   :  { %v797_v1 = vadd.f32 %v796_v56, %v795_v40  ;;  %v872_v13 = vrot.slane %v871_v39, 1 }
 0x2d9   :  { %v798_v17 = vmul.f32 0.0078125, %v776_v42  ;;  %v852_v23 = vadd.f32 %v851_v61, %v850_v54 }
 0x2da   :  { %v799_v37 = vmul.f32 0.0078125, %v797_v1  ;;  %v873_v63 = vadd.f32 %v872_v13, %v871_v39 }
 0x2db   :  { %v874_v59 = vmul.f32 0.0078125, %v852_v23  ;;  %v876_v6 = vmul.f32 %v798_v17, %v798_v17 }
 0x2dc   :  { %v875_v0 = vmul.f32 0.0078125, %v873_v63  ;;  %v877_v29 = vmul.f32 %v799_v37, %v799_v37 }
 0x2dd   :  { %v878_v11 = vsub.f32 %v874_v59, %v876_v6 }
 0x2de   :  { %v879_v16 = vsub.f32 %v875_v0, %v877_v29 }
 0x2df   :  { %v880_v24 = vmax.f32 %v878_v11, 0.0 }
 0x2e0   :  { %v881_v31 = vmax.f32 %v879_v16, 0.0 }
 0x2e1   :  { %v886_v2 = vadd.f32 1e-05, %v880_v24 }
 0x2e2   :  { %v887_v4 = vadd.f32 1e-05, %v881_v31 }
 0x2e3   :  { %1815 = vrsqrt.f32 %v886_v2 }
 0x2e4   :  { %1817 = vrsqrt.f32 %v887_v4 }
 0x2ed   :  { %v1816_v12 = vpop.eup %1815 }
 0x2ee   :  { %v1818_v15 = vpop.eup %1817 }
 0x2ef   :  { %v892_v21 = vcombine.low %v1816_v12, %v1818_v15 }
 0x2f1   :  { %v899_v25 = vrot.slane %v892_v21, %v2141_v8 }
 0x2f3   :  { %v906_v40 = vrot.slane %v899_v25, %v2141_v8 }
 0x2f5   :  { %v908_v41 = vmul.f32 %v1752_v35, %v906_v40 }
 0x2f7   :  { %v913_v48 = vrot.slane %v908_v41, %v2148_v19  ;;  %v917_v54 = vrot.slane %v908_v41, %v2150_v20 }
 0x2f9   :  { %v920_v56 = vmul.f32 %v913_v48, %v798_v17  ;;  %v921_v39 = vmul.f32 %v917_v54, %v799_v37  ;;  %v941_v42 = vmul.f32 %v913_v48, %v2349_v51  ;;  %v942_v61 = vmul.f32 %v917_v54, %v2351_v38 }
 0x2fa   :  { %v943_v1 = vmul.f32 %v913_v48, %v2353_v44  ;;  %v944_v13 = vmul.f32 %v917_v54, %v2361_v52  ;;  %v945_v23 = vmul.f32 %v913_v48, %v2369_v45  ;;  %v946_v63 = vmul.f32 %v917_v54, %v2374_v58 }
 0x2fb   :  { %v924_v59 = vcombine.low %v920_v56, %v921_v39  ;;  %v947_v6 = vmul.f32 %v913_v48, %v2379_v7  ;;  %v948_v0 = vmul.f32 %v917_v54, %v2384_v57  ;;  %v949_v17 = vmul.f32 %v913_v48, %v2389_v62  ;;  %v1753_v57 = vld [vmem:[%s3202_s2 + $0x4] ss:$8 sm:$0x3] }
 0x2fc   :  { %v950_v37 = vmul.f32 %v917_v54, %v2394_v53  ;;  %v951_v51 = vmul.f32 %v913_v48, %v2399_v26  ;;  %v952_v38 = vmul.f32 %v917_v54, %v2404_v3  ;;  %v953_v44 = vmul.f32 %v913_v48, %v2409_v43 }
 0x2fd   :  { %v931_v52 = vrot.slane %v924_v59, %v2141_v8  ;;  %v954_v45 = vmul.f32 %v917_v54, %v2414_v5  ;;  %v955_v58 = vmul.f32 %v913_v48, %v2419_v14  ;;  %v956_v7 = vmul.f32 %v917_v54, %v2424_v22 }
 0x2fe   :  { %v957_v62 = vmul.f32 %v913_v48, %v2429_v47  ;;  %v958_v53 = vmul.f32 %v917_v54, %v2434_v34  ;;  %v959_v26 = vmul.f32 %v913_v48, %v2439_v33  ;;  %v960_v3 = vmul.f32 %v917_v54, %v2444_v55 }
 0x2ff   :  { %v938_v43 = vrot.slane %v931_v52, %v2141_v8  ;;  %v961_v5 = vmul.f32 %v913_v48, %v2449_v60  ;;  %v962_v14 = vmul.f32 %v917_v54, %v2454_v32  ;;  %v963_v22 = vmul.f32 %v913_v48, %v2459_v50 }
 0x300   :  { %v964_v29 = vmul.f32 %v917_v54, %v2464_v27  ;;  %v965_v11 = vmul.f32 %v913_v48, %v2469_v36  ;;  %v966_v47 = vmul.f32 %v917_v54, %v2474_v9  ;;  %v967_v34 = vmul.f32 %v913_v48, %v2479_v18 }
 0x301   :  { %v940_v16 = vsub.f32 %v1753_v57, %v938_v43  ;;  %v968_v33 = vmul.f32 %v917_v54, %v2484_v30  ;;  %v969_v55 = vmul.f32 %v913_v48, %v2489_v28  ;;  %v970_v24 = vmul.f32 %v917_v54, %v2494_v49 }
 0x302   :  { %v971_v60 = vmul.f32 %v913_v48, %v2499_v10  ;;  %v972_v32 = vmul.f32 %v917_v54, %v2504_v46 }
 0x303   :  { %v977_v50 = vrot.slane %v940_v16, %v2148_v19  ;;  %v981_v27 = vrot.slane %v940_v16, %v2150_v20 }
 0x305   :  { %v2555_v36 = vadd.f32 %v977_v50, %v941_v42  ;;  %v2557_v9 = vadd.f32 %v981_v27, %v942_v61  ;;  %v2559_v18 = vadd.f32 %v977_v50, %v943_v1  ;;  %v2561_v31 = vadd.f32 %v981_v27, %v944_v13 }
 0x306   :  { %v2563_v30 = vadd.f32 %v977_v50, %v945_v23  ;;  %v2565_v28 = vadd.f32 %v981_v27, %v946_v63  ;;  %v2567_v49 = vadd.f32 %v977_v50, %v947_v6  ;;  %v2569_v10 = vadd.f32 %v981_v27, %v948_v0 }
 0x307   :  { %v2571_v46 = vadd.f32 %v977_v50, %v949_v17  ;;  %v2573_v2 = vadd.f32 %v981_v27, %v950_v37  ;;  %v2575_v4 = vadd.f32 %v977_v50, %v951_v51  ;;  %v2577_v12 = vadd.f32 %v981_v27, %v952_v38 }
 0x308   :  { %v2579_v15 = vadd.f32 %v977_v50, %v953_v44  ;;  %v2581_v21 = vadd.f32 %v981_v27, %v954_v45  ;;  %v2583_v25 = vadd.f32 %v977_v50, %v955_v58  ;;  %v2585_v35 = vadd.f32 %v981_v27, %v956_v7 }
 0x309   :  { %v2587_v40 = vadd.f32 %v977_v50, %v957_v62  ;;  %v2589_v41 = vadd.f32 %v981_v27, %v958_v53  ;;  %v2591_v48 = vadd.f32 %v977_v50, %v959_v26  ;;  %v2593_v54 = vadd.f32 %v981_v27, %v960_v3 }
 0x30a   :  { %v2595_v56 = vadd.f32 %v977_v50, %v961_v5  ;;  %v2597_v39 = vadd.f32 %v981_v27, %v962_v14  ;;  %v2599_v42 = vadd.f32 %v977_v50, %v963_v22  ;;  %v2601_v61 = vadd.f32 %v981_v27, %v964_v29 }
 0x30b   :  { %v2603_v1 = vadd.f32 %v977_v50, %v965_v11  ;;  %v2605_v13 = vadd.f32 %v981_v27, %v966_v47  ;;  %v2607_v23 = vadd.f32 %v977_v50, %v967_v34  ;;  %v2609_v63 = vadd.f32 %v981_v27, %v968_v33 }
 0x30c   :  { %v2611_v59 = vadd.f32 %v977_v50, %v969_v55  ;;  %v2613_v6 = vadd.f32 %v981_v27, %v970_v24  ;;  %v2615_v0 = vadd.f32 %v977_v50, %v971_v60  ;;  %v2617_v17 = vadd.f32 %v981_v27, %v972_v32 }
 0x30d   :  { %v1016_v37 = vmax.f32 %v2555_v36, 0.0  ;;  %v1017_v51 = vmax.f32 %v2557_v9, 0.0  ;;  %v1018_v38 = vmax.f32 %v2559_v18, 0.0  ;;  %v1019_v44 = vmax.f32 %v2561_v31, 0.0 }
 0x30e   :  { %v1020_v52 = vmax.f32 %v2563_v30, 0.0  ;;  %v1021_v45 = vmax.f32 %v2565_v28, 0.0  ;;  %v1022_v58 = vmax.f32 %v2567_v49, 0.0  ;;  %v1023_v7 = vmax.f32 %v2569_v10, 0.0 }
 0x30f   :  { %v1024_v57 = vmax.f32 %v2571_v46, 0.0  ;;  %v1025_v62 = vmax.f32 %v2573_v2, 0.0  ;;  %v1026_v53 = vmax.f32 %v2575_v4, 0.0  ;;  %v1027_v26 = vmax.f32 %v2577_v12, 0.0 }
 0x310   :  { %v1028_v3 = vmax.f32 %v2579_v15, 0.0  ;;  %v1029_v43 = vmax.f32 %v2581_v21, 0.0  ;;  %v1030_v5 = vmax.f32 %v2583_v25, 0.0  ;;  %v1031_v14 = vmax.f32 %v2585_v35, 0.0 }
 0x311   :  { %v1032_v22 = vmax.f32 %v2587_v40, 0.0  ;;  %v1033_v29 = vmax.f32 %v2589_v41, 0.0  ;;  %v1034_v11 = vmax.f32 %v2591_v48, 0.0  ;;  %v1035_v47 = vmax.f32 %v2593_v54, 0.0 }
 0x312   :  { %v1041_v60 = vmax.f32 %v2605_v13, 0.0 }
 0x313   :  { %1825 = dma.done.wait [#allocation3 + $0x1], 4096 }
 0x314   :  { %1826 = vsyncadd [#allocation3 + $0x1], 4294963200  ;;  %v1051_v33 = vpack.c.bf16 %v1019_v44, %v1017_v51  ;;  %v1067_v55 = vld [vmem:[#allocation2 + $0x108] sm:$0xff]  ;;  %v1066_v24 = vld [vmem:[#allocation2 + $0x100] sm:$0xff]  ;;  %v1055_v36 = vpack.c.bf16 %v1027_v26, %v1025_v62  ;;  %v1054_v18 = vpack.c.bf16 %v1026_v53, %v1024_v57  ;;  %v1057_v30 = vpack.c.bf16 %v1031_v14, %v1029_v43 }
 0x315   :  { %v1069_v16 = vld [vmem:[#allocation2 + $0x118] sm:$0xff]  ;;  %1098 = vmatprep.subr.bf16.mxu0 %v1067_v55  ;;  %v1068_v32 = vld [vmem:[#allocation2 + $0x110] sm:$0xff]  ;;  %v1071_v50 = vld [vmem:[#allocation2 + $0x128] sm:$0xff]  ;;  %v1056_v28 = vpack.c.bf16 %v1030_v5, %v1028_v3  ;;  %v1059_v49 = vpack.c.bf16 %v1035_v47, %v1033_v29  ;;  %v1058_v10 = vpack.c.bf16 %v1034_v11, %v1032_v22  ;;  %v3216_v46 = vmax.f32 %v2597_v39, 0.0 }
 0x316   :  { %1130 = vmatprep.mubr.bf16.mxu0 %v1051_v33  ;;  %1099 = vmatpush1.bf16.msra.mxu0 %v1066_v24  ;;  %v1070_v27 = vld [vmem:[#allocation2 + $0x120] sm:$0xff]  ;;  %v1073_v9 = vld [vmem:[#allocation2 + $0x138] sm:$0xff]  ;;  %v1072_v31 = vld [vmem:[#allocation2 + $0x130] sm:$0xff]  ;;  %v3217_v2 = vmax.f32 %v2601_v61, 0.0  ;;  %v3218_v12 = vmax.f32 %v2595_v56, 0.0  ;;  %v3219_v15 = vmax.f32 %v2599_v42, 0.0 }
 0x317   :  { %1100 = vmatprep.subr.bf16.mxu0 %v1069_v16  ;;  %v1075_v34 = vld [vmem:[#allocation2 + $0x148] sm:$0xff]  ;;  %v1074_v51 = vld [vmem:[#allocation2 + $0x140] sm:$0xff]  ;;  %v1077_v44 = vld [vmem:[#allocation2 + $0x158] sm:$0xff]  ;;  %v3220_v25 = vmax.f32 %v2609_v63, 0.0  ;;  %v3221_v40 = vmax.f32 %v2603_v1, 0.0  ;;  %v3222_v41 = vmax.f32 %v2607_v23, 0.0 }
 0x318   :  { %v1076_v33 = vld [vmem:[#allocation2 + $0x150] sm:$0xff]  ;;  %v1079_v55 = vld [vmem:[#allocation2 + $0x168] sm:$0xff]  ;;  %v1078_v16 = vld [vmem:[#allocation2 + $0x160] sm:$0xff]  ;;  %v1061_v4 = vpack.c.bf16 %v3217_v2, %v3216_v46  ;;  %v1060_v21 = vpack.c.bf16 %v3219_v15, %v3218_v12  ;;  %v3223_v54 = vmax.f32 %v2613_v6, 0.0  ;;  %v3224_v39 = vmax.f32 %v2617_v17, 0.0 }
 0x319   :  { %v1081_v24 = vld [vmem:[#allocation2 + $0x178] sm:$0xff]  ;;  %v1063_v35 = vpack.c.bf16 %v3220_v25, %v1041_v60  ;;  %v1062_v48 = vpack.c.bf16 %v3222_v41, %v3221_v40  ;;  %v3225_v42 = vmax.f32 %v2611_v59, 0.0  ;;  %v3226_v61 = vmax.f32 %v2615_v0, 0.0 }
 0x31a   :  { %1101 = vmatpush1.bf16.msra.mxu0 %v1068_v32  ;;  %v1080_v32 = vld [vmem:[#allocation2 + $0x170] sm:$0xff]  ;;  %v1065_v56 = vpack.c.bf16 %v3224_v39, %v3223_v54 }
 0x31b   :  { %1102 = vmatprep.subr.bf16.mxu0 %v1071_v50  ;;  %v1083_v50 = vld [vmem:[#allocation2 + $0x188] sm:$0xff]  ;;  %v1064_v13 = vpack.c.bf16 %v3226_v61, %v3225_v42 }
 0x31e   :  { %1103 = vmatpush1.bf16.msra.mxu0 %v1070_v27  ;;  %v1082_v27 = vld [vmem:[#allocation2 + $0x180] sm:$0xff] }
 0x31f   :  { %1104 = vmatprep.subr.bf16.mxu0 %v1073_v9  ;;  %v1085_v9 = vld [vmem:[#allocation2 + $0x198] sm:$0xff] }
 0x322   :  { %1105 = vmatpush1.bf16.msra.mxu0 %v1072_v31  ;;  %v1087_v31 = vld [vmem:[#allocation2 + $0x1a8] sm:$0xff] }
 0x323   :  { %1106 = vmatprep.subr.bf16.mxu0 %v1075_v34  ;;  %v1084_v34 = vld [vmem:[#allocation2 + $0x190] sm:$0xff] }
 0x326   :  { %1107 = vmatpush1.bf16.msra.mxu0 %v1074_v51  ;;  %v1086_v51 = vld [vmem:[#allocation2 + $0x1a0] sm:$0xff] }
 0x327   :  { %1108 = vmatprep.subr.bf16.mxu0 %v1077_v44  ;;  %v1089_v44 = vld [vmem:[#allocation2 + $0x1b8] sm:$0xff] }
 0x32a   :  { %1109 = vmatpush1.bf16.msra.mxu0 %v1076_v33  ;;  %v1088_v33 = vld [vmem:[#allocation2 + $0x1b0] sm:$0xff] }
 0x32b   :  { %1110 = vmatprep.subr.bf16.mxu0 %v1079_v55  ;;  %v1091_v55 = vld [vmem:[#allocation2 + $0x1c8] sm:$0xff] }
 0x32e   :  { %1111 = vmatpush1.bf16.msra.mxu0 %v1078_v16  ;;  %v1090_v16 = vld [vmem:[#allocation2 + $0x1c0] sm:$0xff] }
 0x32f   :  { %1112 = vmatprep.subr.bf16.mxu0 %v1081_v24  ;;  %v1093_v24 = vld [vmem:[#allocation2 + $0x1d8] sm:$0xff] }
 0x332   :  { %1113 = vmatpush1.bf16.msra.mxu0 %v1080_v32  ;;  %v1092_v32 = vld [vmem:[#allocation2 + $0x1d0] sm:$0xff] }
 0x333   :  { %1114 = vmatprep.subr.bf16.mxu0 %v1083_v50  ;;  %v1095_v50 = vld [vmem:[#allocation2 + $0x1e8] sm:$0xff] }
 0x336   :  { %1115 = vmatpush1.bf16.msra.mxu0 %v1082_v27  ;;  %v1094_v27 = vld [vmem:[#allocation2 + $0x1e0] sm:$0xff] }
 0x337   :  { %1116 = vmatprep.subr.bf16.mxu0 %v1085_v9  ;;  %v1097_v9 = vld [vmem:[#allocation2 + $0x1f8] sm:$0xff] }
 0x33a   :  { %1117 = vmatpush1.bf16.msra.mxu0 %v1084_v34  ;;  %v1096_v34 = vld [vmem:[#allocation2 + $0x1f0] sm:$0xff] }
 0x33b   :  { %1118 = vmatprep.subr.bf16.mxu0 %v1087_v31  ;;  %v1050_v31 = vpack.c.bf16 %v1018_v38, %v1016_v37 }
 0x33e   :  { %1119 = vmatpush1.bf16.msra.mxu0 %v1086_v51  ;;  %v1053_v51 = vpack.c.bf16 %v1023_v7, %v1021_v45 }
 0x33f   :  { %1120 = vmatprep.subr.bf16.mxu0 %v1089_v44  ;;  %v1052_v44 = vpack.c.bf16 %v1022_v58, %v1020_v52 }
 0x342   :  { %1121 = vmatpush1.bf16.msra.mxu0 %v1088_v33 }
 0x343   :  { %1122 = vmatprep.subr.bf16.mxu0 %v1091_v55 }
 0x346   :  { %1123 = vmatpush1.bf16.msra.mxu0 %v1090_v16 }
 0x347   :  { %1124 = vmatprep.subr.bf16.mxu0 %v1093_v24 }
 0x34a   :  { %1125 = vmatpush1.bf16.msra.mxu0 %v1092_v32 }
 0x34b   :  { %1126 = vmatprep.subr.bf16.mxu0 %v1095_v50 }
 0x34e   :  { %1127 = vmatpush1.bf16.msra.mxu0 %v1094_v27 }
 0x34f   :  { %1128 = vmatprep.subr.bf16.mxu0 %v1097_v9 }
 0x352   :  { %1129 = vmatpush1.bf16.msra.mxu0 %v1096_v34 }
 0x355   :  { %1131 = vmatmul.mubr.bf16.vlgmr.msra.gmra.mrb[32].mxu0 %v1050_v31 }
 0x356   :  { %1140 = vmatprep.mubr.bf16.mxu0 %v1053_v51 }
 0x35d   :  { %1141 = vmatmul.mubr.bf16.gmra.mrb[36].mxu0 %v1052_v44 }
 0x35e   :  { %1150 = vmatprep.mubr.bf16.mxu0 %v1055_v36 }
 0x365   :  { %1151 = vmatmul.mubr.bf16.gmra.mrb[40].mxu0 %v1054_v18 }
 0x366   :  { %1160 = vmatprep.mubr.bf16.mxu0 %v1057_v30 }
 0x36d   :  { %1161 = vmatmul.mubr.bf16.gmra.mrb[44].mxu0 %v1056_v28 }
 0x36e   :  { %1170 = vmatprep.mubr.bf16.mxu0 %v1059_v49 }
 0x375   :  { %1171 = vmatmul.mubr.bf16.gmra.mrb[48].mxu0 %v1058_v10 }
 0x376   :  { %1180 = vmatprep.mubr.bf16.mxu0 %v1061_v4 }
 0x37d   :  { %1181 = vmatmul.mubr.bf16.gmra.mrb[52].mxu0 %v1060_v21 }
 0x37e   :  { %1190 = vmatprep.mubr.bf16.mxu0 %v1063_v35 }
 0x385   :  { %1191 = vmatmul.mubr.bf16.gmra.mrb[56].mxu0 %v1062_v48 }
 0x386   :  { %1200 = vmatprep.mubr.bf16.mxu0 %v1065_v56 }
 0x38d   :  { %1201 = vmatmul.mubr.bf16.gmra.mrb[60].mxu0 %v1064_v13 }
 0x428   :  { %v2711_v63 = vpop.f32.mrb[32].mxu0 }
 0x429   :  { %v2713_v37 = vpop.f32.mrb[33].mxu0  ;;  %v1255_v23 = vmul.f32 %v2711_v63, %v2711_v63 }
 0x42a   :  { %v2715_v1 = vpop.f32.mrb[34].mxu0  ;;  %v1256_v0 = vmul.f32 %v2713_v37, %v2713_v37 }
 0x42b   :  { %v1211_v6 = vadd.f32 %v2715_v1, %v2711_v63  ;;  %v1257_v17 = vmul.f32 %v2715_v1, %v2715_v1  ;;  %v2723_v59 = vpop.f32.mrb[35].mxu0 }
 0x42c   :  { %v1232_v38 = vadd.f32 %v2723_v59, %v2713_v37  ;;  %v1258_v52 = vmul.f32 %v2723_v59, %v2723_v59 }
 0x42d   :  { %v1287_v45 = vadd.f32 %v1257_v17, %v1255_v23 }
 0x42e   :  { %v1308_v58 = vadd.f32 %v1258_v52, %v1256_v0 }
 0x430   :  { %v2731_v7 = vpop.f32.mrb[36].mxu0 }
 0x431   :  { %v1212_v57 = vadd.f32 %v1211_v6, %v2731_v7  ;;  %v1259_v62 = vmul.f32 %v2731_v7, %v2731_v7  ;;  %v2736_v53 = vpop.f32.mrb[37].mxu0 }
 0x432   :  { %v1233_v26 = vadd.f32 %v1232_v38, %v2736_v53  ;;  %v1260_v3 = vmul.f32 %v2736_v53, %v2736_v53  ;;  %v2741_v43 = vpop.f32.mrb[38].mxu0 }
 0x433   :  { %v1288_v5 = vadd.f32 %v1287_v45, %v1259_v62  ;;  %v1213_v14 = vadd.f32 %v1212_v57, %v2741_v43  ;;  %v1261_v22 = vmul.f32 %v2741_v43, %v2741_v43  ;;  %v2746_v29 = vpop.f32.mrb[39].mxu0 }
 0x434   :  { %v1309_v11 = vadd.f32 %v1308_v58, %v1260_v3  ;;  %v1234_v47 = vadd.f32 %v1233_v26, %v2746_v29  ;;  %v1262_v60 = vmul.f32 %v2746_v29, %v2746_v29 }
 0x435   :  { %v1289_v33 = vadd.f32 %v1288_v5, %v1261_v22 }
 0x436   :  { %v1310_v55 = vadd.f32 %v1309_v11, %v1262_v60 }
 0x438   :  { %v2751_v16 = vpop.f32.mrb[40].mxu0 }
 0x439   :  { %v1214_v24 = vadd.f32 %v1213_v14, %v2751_v16  ;;  %v1263_v32 = vmul.f32 %v2751_v16, %v2751_v16  ;;  %v2756_v50 = vpop.f32.mrb[41].mxu0 }
 0x43a   :  { %v1235_v27 = vadd.f32 %v1234_v47, %v2756_v50  ;;  %v1264_v9 = vmul.f32 %v2756_v50, %v2756_v50  ;;  %v2761_v34 = vpop.f32.mrb[42].mxu0 }
 0x43b   :  { %v1290_v31 = vadd.f32 %v1289_v33, %v1263_v32  ;;  %v1215_v51 = vadd.f32 %v1214_v24, %v2761_v34  ;;  %v1265_v44 = vmul.f32 %v2761_v34, %v2761_v34  ;;  %v2766_v36 = vpop.f32.mrb[43].mxu0 }
 0x43c   :  { %v1311_v18 = vadd.f32 %v1310_v55, %v1264_v9  ;;  %v1236_v30 = vadd.f32 %v1235_v27, %v2766_v36  ;;  %v1266_v28 = vmul.f32 %v2766_v36, %v2766_v36 }
 0x43d   :  { %v1291_v49 = vadd.f32 %v1290_v31, %v1265_v44 }
 0x43e   :  { %v1312_v10 = vadd.f32 %v1311_v18, %v1266_v28 }
 0x440   :  { %v2771_v46 = vpop.f32.mrb[44].mxu0 }
 0x441   :  { %v1216_v2 = vadd.f32 %v1215_v51, %v2771_v46  ;;  %v1267_v4 = vmul.f32 %v2771_v46, %v2771_v46  ;;  %v2776_v12 = vpop.f32.mrb[45].mxu0 }
 0x442   :  { %v1237_v15 = vadd.f32 %v1236_v30, %v2776_v12  ;;  %v1268_v21 = vmul.f32 %v2776_v12, %v2776_v12  ;;  %v2781_v25 = vpop.f32.mrb[46].mxu0 }
 0x443   :  { %v1292_v35 = vadd.f32 %v1291_v49, %v1267_v4  ;;  %v1217_v40 = vadd.f32 %v1216_v2, %v2781_v25  ;;  %v1269_v41 = vmul.f32 %v2781_v25, %v2781_v25  ;;  %v2786_v48 = vpop.f32.mrb[47].mxu0 }
 0x444   :  { %v1313_v54 = vadd.f32 %v1312_v10, %v1268_v21  ;;  %v1238_v39 = vadd.f32 %v1237_v15, %v2786_v48  ;;  %v1270_v56 = vmul.f32 %v2786_v48, %v2786_v48 }
 0x445   :  { %v1293_v42 = vadd.f32 %v1292_v35, %v1269_v41 }
 0x446   :  { %v1314_v61 = vadd.f32 %v1313_v54, %v1270_v56 }
 0x448   :  { %v2791_v13 = vpop.f32.mrb[48].mxu0 }
 0x449   :  { %v1218_v23 = vadd.f32 %v1217_v40, %v2791_v13  ;;  %v1271_v6 = vmul.f32 %v2791_v13, %v2791_v13  ;;  %v2796_v17 = vpop.f32.mrb[49].mxu0 }
 0x44a   :  { %v1239_v0 = vadd.f32 %v1238_v39, %v2796_v17  ;;  %v1272_v38 = vmul.f32 %v2796_v17, %v2796_v17  ;;  %v2801_v52 = vpop.f32.mrb[50].mxu0 }
 0x44b   :  { %v1294_v45 = vadd.f32 %v1293_v42, %v1271_v6  ;;  %v1219_v58 = vadd.f32 %v1218_v23, %v2801_v52  ;;  %v1273_v57 = vmul.f32 %v2801_v52, %v2801_v52  ;;  %v2806_v62 = vpop.f32.mrb[51].mxu0 }
 0x44c   :  { %v1315_v26 = vadd.f32 %v1314_v61, %v1272_v38  ;;  %v1240_v3 = vadd.f32 %v1239_v0, %v2806_v62  ;;  %v1274_v5 = vmul.f32 %v2806_v62, %v2806_v62 }
 0x44d   :  { %v1295_v14 = vadd.f32 %v1294_v45, %v1273_v57 }
 0x44e   :  { %v1316_v22 = vadd.f32 %v1315_v26, %v1274_v5 }
 0x450   :  { %v2811_v11 = vpop.f32.mrb[52].mxu0 }
 0x451   :  { %v1220_v47 = vadd.f32 %v1219_v58, %v2811_v11  ;;  %v1275_v60 = vmul.f32 %v2811_v11, %v2811_v11  ;;  %v2816_v33 = vpop.f32.mrb[53].mxu0 }
 0x452   :  { %v1241_v55 = vadd.f32 %v1240_v3, %v2816_v33  ;;  %v1276_v24 = vmul.f32 %v2816_v33, %v2816_v33  ;;  %v2821_v32 = vpop.f32.mrb[54].mxu0 }
 0x453   :  { %v1296_v27 = vadd.f32 %v1295_v14, %v1275_v60  ;;  %v1221_v9 = vadd.f32 %v1220_v47, %v2821_v32  ;;  %v1277_v31 = vmul.f32 %v2821_v32, %v2821_v32  ;;  %v2826_v51 = vpop.f32.mrb[55].mxu0 }
 0x454   :  { %v1317_v44 = vadd.f32 %v1316_v22, %v1276_v24  ;;  %v1242_v18 = vadd.f32 %v1241_v55, %v2826_v51  ;;  %v1278_v30 = vmul.f32 %v2826_v51, %v2826_v51 }
 0x455   :  { %v1297_v28 = vadd.f32 %v1296_v27, %v1277_v31 }
 0x456   :  { %v1318_v49 = vadd.f32 %v1317_v44, %v1278_v30 }
 0x458   :  { %v2831_v10 = vpop.f32.mrb[56].mxu0 }
 0x459   :  { %v1222_v2 = vadd.f32 %v1221_v9, %v2831_v10  ;;  %v1279_v4 = vmul.f32 %v2831_v10, %v2831_v10  ;;  %v2836_v15 = vpop.f32.mrb[57].mxu0 }
 0x45a   :  { %v1243_v21 = vadd.f32 %v1242_v18, %v2836_v15  ;;  %v1280_v35 = vmul.f32 %v2836_v15, %v2836_v15  ;;  %v2841_v40 = vpop.f32.mrb[58].mxu0 }
 0x45b   :  { %v1298_v41 = vadd.f32 %v1297_v28, %v1279_v4  ;;  %v1223_v54 = vadd.f32 %v1222_v2, %v2841_v40  ;;  %v1281_v39 = vmul.f32 %v2841_v40, %v2841_v40  ;;  %v2846_v56 = vpop.f32.mrb[59].mxu0 }
 0x45c   :  { %v1319_v42 = vadd.f32 %v1318_v49, %v1280_v35  ;;  %v1244_v61 = vadd.f32 %v1243_v21, %v2846_v56  ;;  %v1282_v23 = vmul.f32 %v2846_v56, %v2846_v56 }
 0x45d   :  { %v1299_v6 = vadd.f32 %v1298_v41, %v1281_v39 }
 0x45e   :  { %v1320_v0 = vadd.f32 %v1319_v42, %v1282_v23 }
 0x460   :  { %v2851_v38 = vpop.f32.mrb[60].mxu0 }
 0x461   :  { %v1224_v45 = vadd.f32 %v1223_v54, %v2851_v38  ;;  %v1283_v58 = vmul.f32 %v2851_v38, %v2851_v38  ;;  %v2856_v57 = vpop.f32.mrb[61].mxu0 }
 0x462   :  { %v1245_v26 = vadd.f32 %v1244_v61, %v2856_v57  ;;  %v1284_v3 = vmul.f32 %v2856_v57, %v2856_v57  ;;  %v2861_v5 = vpop.f32.mrb[62].mxu0 }
 0x463   :  { %v1300_v14 = vadd.f32 %v1299_v6, %v1283_v58  ;;  %v1225_v22 = vadd.f32 %v1224_v45, %v2861_v5  ;;  %v1285_v47 = vmul.f32 %v2861_v5, %v2861_v5  ;;  %v2866_v60 = vpop.f32.mrb[63].mxu0 }
 0x464   :  { %v1321_v55 = vadd.f32 %v1320_v0, %v1284_v3  ;;  %v1246_v24 = vadd.f32 %v1245_v26, %v2866_v60  ;;  %v1286_v27 = vmul.f32 %v2866_v60, %v2866_v60 }
 0x465   :  { %v1226_v9 = vrot.slane %v1225_v22, 4  ;;  %v1301_v31 = vadd.f32 %v1300_v14, %v1285_v47 }
 0x466   :  { %v1247_v44 = vrot.slane %v1246_v24, 4  ;;  %v1322_v18 = vadd.f32 %v1321_v55, %v1286_v27 }
 0x467   :  { %v1227_v30 = vadd.f32 %v1226_v9, %v1225_v22  ;;  %v1302_v28 = vrot.slane %v1301_v31, 4 }
 0x468   :  { %v1248_v49 = vadd.f32 %v1247_v44, %v1246_v24  ;;  %v1323_v2 = vrot.slane %v1322_v18, 4 }
 0x469   :  { %v1228_v4 = vrot.slane %v1227_v30, 2  ;;  %v1303_v21 = vadd.f32 %v1302_v28, %v1301_v31 }
 0x46a   :  { %v1249_v35 = vrot.slane %v1248_v49, 2  ;;  %v1324_v41 = vadd.f32 %v1323_v2, %v1322_v18 }
 0x46b   :  { %v1229_v54 = vadd.f32 %v1228_v4, %v1227_v30  ;;  %v1304_v39 = vrot.slane %v1303_v21, 2 }
 0x46c   :  { %v1250_v42 = vadd.f32 %v1249_v35, %v1248_v49  ;;  %v1325_v61 = vrot.slane %v1324_v41, 2 }
 0x46d   :  { %v1230_v23 = vrot.slane %v1229_v54, 1  ;;  %v1305_v6 = vadd.f32 %v1304_v39, %v1303_v21  ;;  %v1754_v39 = vld [vmem:[%s3202_s2 + $0x2] ss:$8 sm:$0x3] }
 0x46e   :  { %v1251_v0 = vrot.slane %v1250_v42, 1  ;;  %v1326_v45 = vadd.f32 %v1325_v61, %v1324_v41 }
 0x46f   :  { %v1231_v58 = vadd.f32 %v1230_v23, %v1229_v54  ;;  %v1306_v26 = vrot.slane %v1305_v6, 1 }
 0x470   :  { %v1252_v3 = vadd.f32 %v1251_v0, %v1250_v42  ;;  %v1327_v14 = vrot.slane %v1326_v45, 1 }
 0x471   :  { %v1253_v22 = vmul.f32 0.0078125, %v1231_v58  ;;  %v1307_v47 = vadd.f32 %v1306_v26, %v1305_v6 }
 0x472   :  { %v1254_v55 = vmul.f32 0.0078125, %v1252_v3  ;;  %v1328_v24 = vadd.f32 %v1327_v14, %v1326_v45 }
 0x473   :  { %v1329_v27 = vmul.f32 0.0078125, %v1307_v47  ;;  %v1331_v9 = vmul.f32 %v1253_v22, %v1253_v22 }
 0x474   :  { %v1330_v31 = vmul.f32 0.0078125, %v1328_v24  ;;  %v1332_v44 = vmul.f32 %v1254_v55, %v1254_v55 }
 0x475   :  { %v1333_v18 = vsub.f32 %v1329_v27, %v1331_v9 }
 0x476   :  { %v1334_v30 = vsub.f32 %v1330_v31, %v1332_v44 }
 0x477   :  { %v1335_v28 = vmax.f32 %v1333_v18, 0.0 }
 0x478   :  { %v1336_v49 = vmax.f32 %v1334_v30, 0.0 }
 0x479   :  { %v1341_v2 = vadd.f32 1e-05, %v1335_v28 }
 0x47a   :  { %v1342_v4 = vadd.f32 1e-05, %v1336_v49 }
 0x47b   :  { %1819 = vrsqrt.f32 %v1341_v2 }
 0x47c   :  { %1821 = vrsqrt.f32 %v1342_v4 }
 0x485   :  { %v1820_v21 = vpop.eup %1819 }
 0x486   :  { %v1822_v35 = vpop.eup %1821 }
 0x487   :  { %v1347_v41 = vcombine.low %v1820_v21, %v1822_v35 }
 0x489   :  { %v1354_v54 = vrot.slane %v1347_v41, %v2141_v8 }
 0x48b   :  { %v1361_v42 = vrot.slane %v1354_v54, %v2141_v8 }
 0x48d   :  { %v1363_v61 = vmul.f32 %v1754_v39, %v1361_v42 }
 0x48f   :  { %v1368_v23 = vrot.slane %v1363_v61, %v2148_v19  ;;  %v1372_v6 = vrot.slane %v1363_v61, %v2150_v20 }
 0x491   :  { %v1375_v0 = vmul.f32 %v1368_v23, %v1253_v22  ;;  %v1376_v45 = vmul.f32 %v1372_v6, %v1254_v55  ;;  %v1396_v58 = vmul.f32 %v1368_v23, %v2711_v63  ;;  %v1397_v26 = vmul.f32 %v1372_v6, %v2713_v37 }
 0x492   :  { %v1398_v3 = vmul.f32 %v1368_v23, %v2715_v1  ;;  %v1399_v14 = vmul.f32 %v1372_v6, %v2723_v59  ;;  %v1400_v47 = vmul.f32 %v1368_v23, %v2731_v7  ;;  %v1401_v24 = vmul.f32 %v1372_v6, %v2736_v53 }
 0x493   :  { %v1379_v27 = vcombine.low %v1375_v0, %v1376_v45  ;;  %v1402_v9 = vmul.f32 %v1368_v23, %v2741_v43  ;;  %v1403_v31 = vmul.f32 %v1372_v6, %v2746_v29  ;;  %v1404_v22 = vmul.f32 %v1368_v23, %v2751_v16  ;;  %v1755_v29 = vld [vmem:[%s3202_s2 + $0x5] ss:$8 sm:$0x3] }
 0x494   :  { %v1405_v55 = vmul.f32 %v1372_v6, %v2756_v50  ;;  %v1406_v63 = vmul.f32 %v1368_v23, %v2761_v34  ;;  %v1407_v37 = vmul.f32 %v1372_v6, %v2766_v36  ;;  %v1408_v1 = vmul.f32 %v1368_v23, %v2771_v46 }
 0x495   :  { %v1386_v59 = vrot.slane %v1379_v27, %v2141_v8  ;;  %v1409_v7 = vmul.f32 %v1372_v6, %v2776_v12  ;;  %v1410_v53 = vmul.f32 %v1368_v23, %v2781_v25  ;;  %v1411_v43 = vmul.f32 %v1372_v6, %v2786_v48 }
 0x496   :  { %v1412_v16 = vmul.f32 %v1368_v23, %v2791_v13  ;;  %v1413_v50 = vmul.f32 %v1372_v6, %v2796_v17  ;;  %v1414_v34 = vmul.f32 %v1368_v23, %v2801_v52  ;;  %v1415_v36 = vmul.f32 %v1372_v6, %v2806_v62 }
 0x497   :  { %v1393_v46 = vrot.slane %v1386_v59, %v2141_v8  ;;  %v1416_v12 = vmul.f32 %v1368_v23, %v2811_v11  ;;  %v1417_v25 = vmul.f32 %v1372_v6, %v2816_v33  ;;  %v1418_v48 = vmul.f32 %v1368_v23, %v2821_v32 }
 0x498   :  { %v1419_v44 = vmul.f32 %v1372_v6, %v2826_v51  ;;  %v1420_v18 = vmul.f32 %v1368_v23, %v2831_v10  ;;  %v1421_v13 = vmul.f32 %v1372_v6, %v2836_v15  ;;  %v1422_v17 = vmul.f32 %v1368_v23, %v2841_v40 }
 0x499   :  { %v1395_v30 = vsub.f32 %v1755_v29, %v1393_v46  ;;  %v1423_v52 = vmul.f32 %v1372_v6, %v2846_v56  ;;  %v1424_v62 = vmul.f32 %v1368_v23, %v2851_v38  ;;  %v1425_v8 = vmul.f32 %v1372_v6, %v2856_v57 }
 0x49a   :  { %v1426_v11 = vmul.f32 %v1368_v23, %v2861_v5  ;;  %v1427_v33 = vmul.f32 %v1372_v6, %v2866_v60 }
 0x49b   :  { %v1432_v32 = vrot.slane %v1395_v30, %v2148_v19  ;;  %v1436_v51 = vrot.slane %v1395_v30, %v2150_v20 }
 0x49d   :  { %v2917_v10 = vadd.f32 %v1432_v32, %v1396_v58  ;;  %v2919_v15 = vadd.f32 %v1436_v51, %v1397_v26  ;;  %v2921_v40 = vadd.f32 %v1432_v32, %v1398_v3  ;;  %v2923_v28 = vadd.f32 %v1436_v51, %v1399_v14 }
 0x49e   :  { %v2925_v56 = vadd.f32 %v1432_v32, %v1400_v47  ;;  %v2927_v38 = vadd.f32 %v1436_v51, %v1401_v24  ;;  %v2929_v57 = vadd.f32 %v1432_v32, %v1402_v9  ;;  %v2931_v5 = vadd.f32 %v1436_v51, %v1403_v31 }
 0x49f   :  { %v2933_v60 = vadd.f32 %v1432_v32, %v1404_v22  ;;  %v2935_v49 = vadd.f32 %v1436_v51, %v1405_v55  ;;  %v2937_v2 = vadd.f32 %v1432_v32, %v1406_v63  ;;  %v2939_v4 = vadd.f32 %v1436_v51, %v1407_v37 }
 0x4a0   :  { %v2941_v21 = vadd.f32 %v1432_v32, %v1408_v1  ;;  %v1452_v35 = vadd.f32 %v1436_v51, %v1409_v7  ;;  %v2943_v41 = vadd.f32 %v1432_v32, %v1410_v53  ;;  %v1454_v54 = vadd.f32 %v1436_v51, %v1411_v43 }
 0x4a1   :  { %v2945_v39 = vadd.f32 %v1432_v32, %v1412_v16  ;;  %v2947_v42 = vadd.f32 %v1436_v51, %v1413_v50  ;;  %v2949_v61 = vadd.f32 %v1432_v32, %v1414_v34  ;;  %v2951_v23 = vadd.f32 %v1436_v51, %v1415_v36 }
 0x4a2   :  { %v2953_v6 = vadd.f32 %v1432_v32, %v1416_v12  ;;  %v2955_v0 = vadd.f32 %v1436_v51, %v1417_v25  ;;  %v2957_v45 = vadd.f32 %v1432_v32, %v1418_v48  ;;  %v2959_v58 = vadd.f32 %v1436_v51, %v1419_v44 }
 0x4a3   :  { %v2961_v26 = vadd.f32 %v1432_v32, %v1420_v18  ;;  %v2963_v3 = vadd.f32 %v1436_v51, %v1421_v13  ;;  %v2965_v14 = vadd.f32 %v1432_v32, %v1422_v17  ;;  %v2967_v47 = vadd.f32 %v1436_v51, %v1423_v52 }
 0x4a4   :  { %v2969_v24 = vadd.f32 %v1432_v32, %v1424_v62  ;;  %v2971_v27 = vadd.f32 %v1436_v51, %v1425_v8  ;;  %v2973_v9 = vadd.f32 %v1432_v32, %v1426_v11  ;;  %v2975_v31 = vadd.f32 %v1436_v51, %v1427_v33 }
 0x4a5   :  { %v1471_v22 = vmax.f32 %v2917_v10, 0.0  ;;  %v1472_v55 = vmax.f32 %v2919_v15, 0.0  ;;  %v1473_v63 = vmax.f32 %v2921_v40, 0.0  ;;  %v1474_v37 = vmax.f32 %v2923_v28, 0.0 }
 0x4a6   :  { %v1475_v1 = vmax.f32 %v2925_v56, 0.0  ;;  %v1476_v59 = vmax.f32 %v2927_v38, 0.0  ;;  %v1477_v7 = vmax.f32 %v2929_v57, 0.0  ;;  %v1478_v53 = vmax.f32 %v2931_v5, 0.0 }
 0x4a7   :  { %v1479_v43 = vmax.f32 %v2933_v60, 0.0  ;;  %v1480_v29 = vmax.f32 %v2935_v49, 0.0  ;;  %v1482_v50 = vmax.f32 %v2939_v4, 0.0  ;;  %v1483_v34 = vmax.f32 %v2941_v21, 0.0 }
 0x4a8   :  { %v1484_v36 = vmax.f32 %v1452_v35, 0.0  ;;  %v1485_v46 = vmax.f32 %v2943_v41, 0.0  ;;  %v1486_v12 = vmax.f32 %v1454_v54, 0.0  ;;  %v1487_v25 = vmax.f32 %v2945_v39, 0.0 }
 0x4a9   :  { %v1488_v48 = vmax.f32 %v2947_v42, 0.0  ;;  %v1489_v44 = vmax.f32 %v2949_v61, 0.0  ;;  %v1490_v18 = vmax.f32 %v2951_v23, 0.0  ;;  %v1491_v13 = vmax.f32 %v2953_v6, 0.0 }
 0x4aa   :  { %v1492_v17 = vmax.f32 %v2955_v0, 0.0  ;;  %v1493_v30 = vmax.f32 %v2957_v45, 0.0  ;;  %v1494_v52 = vmax.f32 %v2959_v58, 0.0  ;;  %v1497_v11 = vmax.f32 %v2965_v14, 0.0 }
 0x4ab   :  { %v1498_v33 = vmax.f32 %v2967_v47, 0.0  ;;  %v1502_v28 = vmax.f32 %v2975_v31, 0.0 }
 0x4ac   :  { %1827 = dma.done.wait [#allocation3 + $0x2], 4096 }
 0x4ad   :  { %1828 = vsyncadd [#allocation3 + $0x2], 4294963200  ;;  %v1512_v35 = vpack.c.bf16 %v1486_v12, %v1484_v36  ;;  %v1506_v54 = vpack.c.bf16 %v1474_v37, %v1472_v55  ;;  %v1522_v62 = vld [vmem:[#allocation2 + $0x208] sm:$0xff]  ;;  %v1521_v8 = vld [vmem:[#allocation2 + $0x200] sm:$0xff]  ;;  %v1508_v21 = vpack.c.bf16 %v1478_v53, %v1476_v59  ;;  %v1513_v10 = vpack.c.bf16 %v1489_v44, %v1487_v25 }
 0x4ae   :  { %v1524_v16 = vld [vmem:[#allocation2 + $0x218] sm:$0xff]  ;;  %1760 = vmatprep.subr.bf16.mxu1 %v1522_v62  ;;  %1566 = vmatprep.subr.bf16.mxu0 %v1522_v62  ;;  %v1523_v32 = vld [vmem:[#allocation2 + $0x210] sm:$0xff]  ;;  %v1526_v51 = vld [vmem:[#allocation2 + $0x228] sm:$0xff]  ;;  %v1507_v40 = vpack.c.bf16 %v1477_v7, %v1475_v1  ;;  %v1516_v38 = vpack.c.bf16 %v1494_v52, %v1492_v17  ;;  %v1510_v5 = vpack.c.bf16 %v1482_v50, %v1480_v29  ;;  %v3227_v57 = vmax.f32 %v2937_v2, 0.0 }
 0x4af   :  { %1628 = vmatprep.mubr.bf16.mxu1 %v1512_v35  ;;  %1598 = vmatprep.mubr.bf16.mxu0 %v1506_v54  ;;  %v1525_v15 = vld [vmem:[#allocation2 + $0x220] sm:$0xff]  ;;  %v1528_v36 = vld [vmem:[#allocation2 + $0x238] sm:$0xff]  ;;  %v1527_v55 = vld [vmem:[#allocation2 + $0x230] sm:$0xff]  ;;  %v1515_v56 = vpack.c.bf16 %v1493_v30, %v1491_v13  ;;  %v3228_v39 = vmax.f32 %v2963_v3, 0.0  ;;  %v3229_v4 = vmax.f32 %v2961_v26, 0.0  ;;  %v3230_v61 = vmax.f32 %v2971_v27, 0.0 }
 0x4b0   :  { %1776 = vmatpush1.bf16.msra.mxu1 %v1521_v8  ;;  %1567 = vmatpush1.bf16.msra.mxu0 %v1521_v8  ;;  %v1530_v37 = vld [vmem:[#allocation2 + $0x248] sm:$0xff]  ;;  %v1529_v12 = vld [vmem:[#allocation2 + $0x240] sm:$0xff]  ;;  %v1532_v62 = vld [vmem:[#allocation2 + $0x258] sm:$0xff]  ;;  %v1509_v41 = vpack.c.bf16 %v3227_v57, %v1479_v43  ;;  %v3231_v2 = vmax.f32 %v2969_v24, 0.0  ;;  %v3232_v23 = vmax.f32 %v2973_v9, 0.0 }
 0x4b1   :  { %1761 = vmatprep.subr.bf16.mxu1 %v1524_v16  ;;  %1568 = vmatprep.subr.bf16.mxu0 %v1524_v16  ;;  %v1531_v16 = vld [vmem:[#allocation2 + $0x250] sm:$0xff]  ;;  %v1534_v8 = vld [vmem:[#allocation2 + $0x268] sm:$0xff]  ;;  %v1537_v54 = vld [vmem:[#allocation2 + $0x280] sm:$0xff]  ;;  %v1518_v49 = vpack.c.bf16 %v1498_v33, %v3228_v39  ;;  %v1517_v42 = vpack.c.bf16 %v1497_v11, %v3229_v4  ;;  %v1520_v60 = vpack.c.bf16 %v1502_v28, %v3230_v61 }
 0x4b2   :  { %v1538_v35 = vld [vmem:[#allocation2 + $0x288] sm:$0xff]  ;;  %v1519_v6 = vpack.c.bf16 %v3232_v23, %v3231_v2 }
 0x4b3   :  { %v1756_v0 = vld [vmem:[%s3202_s2 + $0x6] ss:$8 sm:$0x3] }
 0x4b4   :  { %1777 = vmatpush1.bf16.msra.mxu1 %v1523_v32  ;;  %1569 = vmatpush1.bf16.msra.mxu0 %v1523_v32  ;;  %v1533_v32 = vld [vmem:[#allocation2 + $0x260] sm:$0xff]  ;;  %v3067_v45 = vrot.slane %v1756_v0, %v2148_v19  ;;  %v3070_v58 = vrot.slane %v1756_v0, %v2150_v20 }
 0x4b5   :  { %1762 = vmatprep.subr.bf16.mxu1 %v1526_v51  ;;  %1570 = vmatprep.subr.bf16.mxu0 %v1526_v51  ;;  %v1536_v51 = vld [vmem:[#allocation2 + $0x278] sm:$0xff] }
 0x4b8   :  { %1778 = vmatpush1.bf16.msra.mxu1 %v1525_v15  ;;  %1571 = vmatpush1.bf16.msra.mxu0 %v1525_v15  ;;  %v1535_v15 = vld [vmem:[#allocation2 + $0x270] sm:$0xff] }
 0x4b9   :  { %1763 = vmatprep.subr.bf16.mxu1 %v1528_v36  ;;  %1572 = vmatprep.subr.bf16.mxu0 %v1528_v36  ;;  %v1540_v36 = vld [vmem:[#allocation2 + $0x298] sm:$0xff] }
 0x4bc   :  { %1779 = vmatpush1.bf16.msra.mxu1 %v1527_v55  ;;  %1573 = vmatpush1.bf16.msra.mxu0 %v1527_v55  ;;  %v1539_v55 = vld [vmem:[#allocation2 + $0x290] sm:$0xff] }
 0x4bd   :  { %1764 = vmatprep.subr.bf16.mxu1 %v1530_v37  ;;  %1574 = vmatprep.subr.bf16.mxu0 %v1530_v37  ;;  %v1542_v37 = vld [vmem:[#allocation2 + $0x2a8] sm:$0xff] }
 0x4c0   :  { %1780 = vmatpush1.bf16.msra.mxu1 %v1529_v12  ;;  %1575 = vmatpush1.bf16.msra.mxu0 %v1529_v12  ;;  %v1541_v12 = vld [vmem:[#allocation2 + $0x2a0] sm:$0xff] }
 0x4c1   :  { %1765 = vmatprep.subr.bf16.mxu1 %v1532_v62  ;;  %1576 = vmatprep.subr.bf16.mxu0 %v1532_v62  ;;  %v1544_v62 = vld [vmem:[#allocation2 + $0x2b8] sm:$0xff] }
 0x4c4   :  { %1781 = vmatpush1.bf16.msra.mxu1 %v1531_v16  ;;  %1577 = vmatpush1.bf16.msra.mxu0 %v1531_v16  ;;  %v1543_v16 = vld [vmem:[#allocation2 + $0x2b0] sm:$0xff] }
 0x4c5   :  { %1766 = vmatprep.subr.bf16.mxu1 %v1534_v8  ;;  %1578 = vmatprep.subr.bf16.mxu0 %v1534_v8  ;;  %v1546_v8 = vld [vmem:[#allocation2 + $0x2c8] sm:$0xff] }
 0x4c8   :  { %1782 = vmatpush1.bf16.msra.mxu1 %v1533_v32  ;;  %1579 = vmatpush1.bf16.msra.mxu0 %v1533_v32  ;;  %v1545_v32 = vld [vmem:[#allocation2 + $0x2c0] sm:$0xff] }
 0x4c9   :  { %1767 = vmatprep.subr.bf16.mxu1 %v1536_v51  ;;  %1580 = vmatprep.subr.bf16.mxu0 %v1536_v51  ;;  %v1548_v51 = vld [vmem:[#allocation2 + $0x2d8] sm:$0xff] }
 0x4cc   :  { %1783 = vmatpush1.bf16.msra.mxu1 %v1535_v15  ;;  %1581 = vmatpush1.bf16.msra.mxu0 %v1535_v15  ;;  %v1547_v15 = vld [vmem:[#allocation2 + $0x2d0] sm:$0xff] }
 0x4cd   :  { %1768 = vmatprep.subr.bf16.mxu1 %v1538_v35  ;;  %1582 = vmatprep.subr.bf16.mxu0 %v1538_v35  ;;  %v1550_v35 = vld [vmem:[#allocation2 + $0x2e8] sm:$0xff] }
 0x4d0   :  { %1784 = vmatpush1.bf16.msra.mxu1 %v1537_v54  ;;  %1583 = vmatpush1.bf16.msra.mxu0 %v1537_v54  ;;  %v1549_v54 = vld [vmem:[#allocation2 + $0x2e0] sm:$0xff] }
 0x4d1   :  { %1769 = vmatprep.subr.bf16.mxu1 %v1540_v36  ;;  %1584 = vmatprep.subr.bf16.mxu0 %v1540_v36  ;;  %v1552_v36 = vld [vmem:[#allocation2 + $0x2f8] sm:$0xff] }
 0x4d4   :  { %1785 = vmatpush1.bf16.msra.mxu1 %v1539_v55  ;;  %1585 = vmatpush1.bf16.msra.mxu0 %v1539_v55  ;;  %v1551_v55 = vld [vmem:[#allocation2 + $0x2f0] sm:$0xff] }
 0x4d5   :  { %1770 = vmatprep.subr.bf16.mxu1 %v1542_v37  ;;  %1586 = vmatprep.subr.bf16.mxu0 %v1542_v37  ;;  %v1511_v37 = vpack.c.bf16 %v1485_v46, %v1483_v34 }
 0x4d8   :  { %1786 = vmatpush1.bf16.msra.mxu1 %v1541_v12  ;;  %1587 = vmatpush1.bf16.msra.mxu0 %v1541_v12  ;;  %v1505_v12 = vpack.c.bf16 %v1473_v63, %v1471_v22 }
 0x4d9   :  { %1771 = vmatprep.subr.bf16.mxu1 %v1544_v62  ;;  %1588 = vmatprep.subr.bf16.mxu0 %v1544_v62  ;;  %v1514_v62 = vpack.c.bf16 %v1490_v18, %v1488_v48 }
 0x4dc   :  { %1787 = vmatpush1.bf16.msra.mxu1 %v1543_v16  ;;  %1589 = vmatpush1.bf16.msra.mxu0 %v1543_v16 }
 0x4dd   :  { %1772 = vmatprep.subr.bf16.mxu1 %v1546_v8  ;;  %1590 = vmatprep.subr.bf16.mxu0 %v1546_v8 }
 0x4e0   :  { %1788 = vmatpush1.bf16.msra.mxu1 %v1545_v32  ;;  %1591 = vmatpush1.bf16.msra.mxu0 %v1545_v32 }
 0x4e1   :  { %1773 = vmatprep.subr.bf16.mxu1 %v1548_v51  ;;  %1592 = vmatprep.subr.bf16.mxu0 %v1548_v51 }
 0x4e4   :  { %1789 = vmatpush1.bf16.msra.mxu1 %v1547_v15  ;;  %1593 = vmatpush1.bf16.msra.mxu0 %v1547_v15 }
 0x4e5   :  { %1774 = vmatprep.subr.bf16.mxu1 %v1550_v35  ;;  %1594 = vmatprep.subr.bf16.mxu0 %v1550_v35 }
 0x4e8   :  { %1790 = vmatpush1.bf16.msra.mxu1 %v1549_v54  ;;  %1595 = vmatpush1.bf16.msra.mxu0 %v1549_v54 }
 0x4e9   :  { %1775 = vmatprep.subr.bf16.mxu1 %v1552_v36  ;;  %1596 = vmatprep.subr.bf16.mxu0 %v1552_v36 }
 0x4ec   :  { %1791 = vmatpush1.bf16.msra.mxu1 %v1551_v55  ;;  %1597 = vmatpush1.bf16.msra.mxu0 %v1551_v55 }
 0x4ef   :  { %1629 = vmatmul.mubr.bf16.vlgmr.msra.gmra.mrb[32].mxu1 %v1511_v37  ;;  %1599 = vmatmul.mubr.bf16.vlgmr.msra.gmra.mrb[64].mxu0 %v1505_v12 }
 0x4f0   :  { %1638 = vmatprep.mubr.bf16.mxu1 %v1514_v62  ;;  %1608 = vmatprep.mubr.bf16.mxu0 %v1508_v21 }
 0x4f7   :  { %1639 = vmatmul.mubr.bf16.gmra.mrb[36].mxu1 %v1513_v10  ;;  %1609 = vmatmul.mubr.bf16.gmra.mrb[68].mxu0 %v1507_v40 }
 0x4f8   :  { %1648 = vmatprep.mubr.bf16.mxu1 %v1516_v38  ;;  %1618 = vmatprep.mubr.bf16.mxu0 %v1510_v5 }
 0x4ff   :  { %1649 = vmatmul.mubr.bf16.gmra.mrb[40].mxu1 %v1515_v56  ;;  %1619 = vmatmul.mubr.bf16.gmra.mrb[72].mxu0 %v1509_v41 }
 0x500   :  { %1658 = vmatprep.mubr.bf16.mxu1 %v1518_v49 }
 0x507   :  { %1659 = vmatmul.mubr.bf16.gmra.mrb[44].mxu1 %v1517_v42 }
 0x508   :  { %1668 = vmatprep.mubr.bf16.mxu1 %v1520_v60 }
 0x50f   :  { %1669 = vmatmul.mubr.bf16.gmra.mrb[48].mxu1 %v1519_v6 }
 0x5c2   :  { %v1630_v26 = vpop.f32.mrb[32].mxu1  ;;  %v1600_v3 = vpop.f32.mrb[64].mxu0 }
 0x5c3   :  { %v1631_v14 = vadd.f32 %v1630_v26, %v3067_v45  ;;  %v1632_v47 = vpop.f32.mrb[33].mxu1  ;;  %v1601_v24 = vadd.f32 %v1600_v3, %v3067_v45  ;;  %v1602_v27 = vpop.f32.mrb[65].mxu0 }
 0x5c4   :  { %v1633_v9 = vadd.f32 %v1632_v47, %v3070_v58  ;;  %v1634_v31 = vpop.f32.mrb[34].mxu1  ;;  %v1603_v22 = vadd.f32 %v1602_v27, %v3070_v58  ;;  %v1604_v63 = vpop.f32.mrb[66].mxu0 }
 0x5c5   :  { %1691 = vst [vmem:[%s3204_s4 + $0x60] sm:$0xff] %v1631_v14  ;;  %v1635_v19 = vadd.f32 %v1634_v31, %v3067_v45  ;;  %v1636_v20 = vpop.f32.mrb[35].mxu1  ;;  %1679 = vst [vmem:[%s3204_s4] sm:$0xff] %v1601_v24  ;;  %v1605_v1 = vadd.f32 %v1604_v63, %v3067_v45  ;;  %v1606_v59 = vpop.f32.mrb[67].mxu0 }
 0x5c6   :  { %1692 = vst [vmem:[%s3204_s4 + $0x68] sm:$0xff] %v1633_v9  ;;  %v1637_v7 = vadd.f32 %v1636_v20, %v3070_v58  ;;  %1680 = vst [vmem:[%s3204_s4 + $0x8] sm:$0xff] %v1603_v22  ;;  %v1607_v53 = vadd.f32 %v1606_v59, %v3070_v58 }
 0x5c7   :  { %1693 = vst [vmem:[%s3204_s4 + $0x70] sm:$0xff] %v1635_v19  ;;  %1681 = vst [vmem:[%s3204_s4 + $0x10] sm:$0xff] %v1605_v1 }
 0x5c8   :  { %1694 = vst [vmem:[%s3204_s4 + $0x78] sm:$0xff] %v1637_v7  ;;  %1682 = vst [vmem:[%s3204_s4 + $0x18] sm:$0xff] %v1607_v53 }
 0x5ca   :  { %v1640_v43 = vpop.f32.mrb[36].mxu1  ;;  %v1610_v29 = vpop.f32.mrb[68].mxu0 }
 0x5cb   :  { %v1641_v50 = vadd.f32 %v1640_v43, %v3067_v45  ;;  %v1642_v34 = vpop.f32.mrb[37].mxu1  ;;  %v1611_v46 = vadd.f32 %v1610_v29, %v3067_v45  ;;  %v1612_v25 = vpop.f32.mrb[69].mxu0 }
 0x5cc   :  { %v1643_v48 = vadd.f32 %v1642_v34, %v3070_v58  ;;  %v1644_v44 = vpop.f32.mrb[38].mxu1  ;;  %v1613_v18 = vadd.f32 %v1612_v25, %v3070_v58  ;;  %v1614_v13 = vpop.f32.mrb[70].mxu0 }
 0x5cd   :  { %1695 = vst [vmem:[%s3204_s4 + $0x80] sm:$0xff] %v1641_v50  ;;  %v1645_v17 = vadd.f32 %v1644_v44, %v3067_v45  ;;  %v1646_v30 = vpop.f32.mrb[39].mxu1  ;;  %1683 = vst [vmem:[%s3204_s4 + $0x20] sm:$0xff] %v1611_v46  ;;  %v1615_v52 = vadd.f32 %v1614_v13, %v3067_v45  ;;  %v1616_v11 = vpop.f32.mrb[71].mxu0 }
 0x5ce   :  { %1696 = vst [vmem:[%s3204_s4 + $0x88] sm:$0xff] %v1643_v48  ;;  %v1647_v33 = vadd.f32 %v1646_v30, %v3070_v58  ;;  %1684 = vst [vmem:[%s3204_s4 + $0x28] sm:$0xff] %v1613_v18  ;;  %v1617_v28 = vadd.f32 %v1616_v11, %v3070_v58 }
 0x5cf   :  { %1697 = vst [vmem:[%s3204_s4 + $0x90] sm:$0xff] %v1645_v17  ;;  %1685 = vst [vmem:[%s3204_s4 + $0x30] sm:$0xff] %v1615_v52 }
 0x5d0   :  { %1698 = vst [vmem:[%s3204_s4 + $0x98] sm:$0xff] %v1647_v33  ;;  %1686 = vst [vmem:[%s3204_s4 + $0x38] sm:$0xff] %v1617_v28 }
 0x5d2   :  { %v1650_v16 = vpop.f32.mrb[40].mxu1  ;;  %v1620_v8 = vpop.f32.mrb[72].mxu0 }
 0x5d3   :  { %v1651_v32 = vadd.f32 %v1650_v16, %v3067_v45  ;;  %v1652_v51 = vpop.f32.mrb[41].mxu1  ;;  %v1621_v15 = vadd.f32 %v1620_v8, %v3067_v45  ;;  %v1622_v35 = vpop.f32.mrb[73].mxu0 }
 0x5d4   :  { %v1653_v54 = vadd.f32 %v1652_v51, %v3070_v58  ;;  %v1654_v36 = vpop.f32.mrb[42].mxu1  ;;  %v1623_v55 = vadd.f32 %v1622_v35, %v3070_v58  ;;  %v1624_v37 = vpop.f32.mrb[74].mxu0 }
 0x5d5   :  { %1699 = vst [vmem:[%s3204_s4 + $0xa0] sm:$0xff] %v1651_v32  ;;  %v1655_v12 = vadd.f32 %v1654_v36, %v3067_v45  ;;  %v1656_v62 = vpop.f32.mrb[43].mxu1  ;;  %1687 = vst [vmem:[%s3204_s4 + $0x40] sm:$0xff] %v1621_v15  ;;  %v1625_v21 = vadd.f32 %v1624_v37, %v3067_v45  ;;  %v1626_v10 = vpop.f32.mrb[75].mxu0 }
 0x5d6   :  { %1700 = vst [vmem:[%s3204_s4 + $0xa8] sm:$0xff] %v1653_v54  ;;  %v1657_v40 = vadd.f32 %v1656_v62, %v3070_v58  ;;  %1688 = vst [vmem:[%s3204_s4 + $0x48] sm:$0xff] %v1623_v55  ;;  %v1627_v38 = vadd.f32 %v1626_v10, %v3070_v58 }
 0x5d7   :  { %1701 = vst [vmem:[%s3204_s4 + $0xb0] sm:$0xff] %v1655_v12  ;;  %1689 = vst [vmem:[%s3204_s4 + $0x50] sm:$0xff] %v1625_v21 }
 0x5d8   :  { %1702 = vst [vmem:[%s3204_s4 + $0xb8] sm:$0xff] %v1657_v40  ;;  %1690 = vst [vmem:[%s3204_s4 + $0x58] sm:$0xff] %v1627_v38 }
 0x5da   :  { %v1660_v5 = vpop.f32.mrb[44].mxu1 }
 0x5db   :  { %v1661_v56 = vadd.f32 %v1660_v5, %v3067_v45  ;;  %v1662_v57 = vpop.f32.mrb[45].mxu1 }
 0x5dc   :  { %v1663_v41 = vadd.f32 %v1662_v57, %v3070_v58  ;;  %v1664_v39 = vpop.f32.mrb[46].mxu1 }
 0x5dd   :  { %1703 = vst [vmem:[%s3204_s4 + $0xc0] sm:$0xff] %v1661_v56  ;;  %v1665_v49 = vadd.f32 %v1664_v39, %v3067_v45  ;;  %v1666_v4 = vpop.f32.mrb[47].mxu1 }
 0x5de   :  { %1704 = vst [vmem:[%s3204_s4 + $0xc8] sm:$0xff] %v1663_v41  ;;  %v1667_v42 = vadd.f32 %v1666_v4, %v3070_v58 }
 0x5df   :  { %1705 = vst [vmem:[%s3204_s4 + $0xd0] sm:$0xff] %v1665_v49 }
 0x5e0   :  { %1706 = vst [vmem:[%s3204_s4 + $0xd8] sm:$0xff] %v1667_v42 }
 0x5e2   :  { %v1670_v61 = vpop.f32.mrb[48].mxu1 }
 0x5e3   :  { %v1671_v60 = vadd.f32 %v1670_v61, %v3067_v45  ;;  %v1672_v2 = vpop.f32.mrb[49].mxu1 }
 0x5e4   :  { %v1673_v23 = vadd.f32 %v1672_v2, %v3070_v58  ;;  %v1674_v6 = vpop.f32.mrb[50].mxu1 }
 0x5e5   :  { %1707 = vst [vmem:[%s3204_s4 + $0xe0] sm:$0xff] %v1671_v60  ;;  %v1675_v0 = vadd.f32 %v1674_v6, %v3067_v45  ;;  %v1676_v26 = vpop.f32.mrb[51].mxu1 }
 0x5e6   :  { %1708 = vst [vmem:[%s3204_s4 + $0xe8] sm:$0xff] %v1673_v23  ;;  %v1677_v3 = vadd.f32 %v1676_v26, %v3070_v58 }
 0x5e7   :  { %1709 = vst [vmem:[%s3204_s4 + $0xf0] sm:$0xff] %v1675_v0 }
 0x5e8   :  { %1710 = vst [vmem:[%s3204_s4 + $0xf8] sm:$0xff] %v1677_v3 }
 0x5e9   :  { %1715 = vsyncmov [#allocation3] }
 0x5ec   :  { %s1716_s13 = vpop.sfrf %1715 }
 0x5ed   :  { %p1757_p0 = scmp.ne.s32.totalorder %s1716_s13, 0 }
 0x5ef   :  { %1720 = shalt.err (%p1757_p0)  }
 0x5f0   :  { %1722 = vsyncmov [#allocation3 + $0x1] }
 0x5f3   :  { %s1723_s14 = vpop.sfrf %1722 }
 0x5f4   :  { %p1758_p1 = scmp.ne.s32.totalorder %s1723_s14, 0 }
 0x5f6   :  { %1727 = shalt.err (%p1758_p1)  }
 0x5f7   :  { %1729 = vsyncmov [#allocation3 + $0x2] }
 0x5fa   :  { %s1730_s15 = vpop.sfrf %1729 }
 0x5fb   :  { %p1759_p2 = scmp.ne.s32.totalorder %s1730_s15, 0 }
 0x5fd   :  { %1734 = shalt.err (%p1759_p2)  }

</bundles_post_ra>
